<compile_context>
chip_gen: v5e
topology: v5e:2x2
jax: 0.10.0
libtpu: 0.0.40
codegen_flags: <defaults>
</compile_context>

<pallas_src>
import jax
import jax.numpy as jnp
from jax import lax
from jax.experimental import pallas as pl
from jax.experimental.pallas import tpu as pltpu

NF = 32                # hidden width of the two MLPs (module arg `nf`)
COORDS_WEIGHT = 1.0
LEAKY_SLOPE = 0.2      # nn.LeakyReLU(0.2)


def _leaky(x):
    return jnp.where(x > 0, x, LEAKY_SLOPE * x)


# ----------------------------- edge-loop kernel ------------------------------
def _edge_kernel(row_ref, rowT_ref, col_ref, xhi_ref, xlo_ref, p_ref, acc_ref):
    """One edge tile: gather, phi, scatter-add into the per-core accumulator."""
    e = pl.program_id(1)

    @pl.when(e == 0)
    def _init():
        acc_ref[...] = jnp.zeros_like(acc_ref)

    f32, bf16 = jnp.float32, jnp.bfloat16
    Np = xhi_ref.shape[1]
    TE = row_ref.shape[1]

    row = row_ref[...]                                        # (1, TE) int32
    col = col_ref[...]                                        # (1, TE) int32

    # Signed gather indicator, built fused (no separate oh_col array); bf16 is
    # exact for {-1, 0, 1}.  The (Np, 1) iota broadcasts inside the compare.
    iota_sub = lax.broadcasted_iota(jnp.int32, (Np, 1), 0)    # (Np, 1)
    D = ((row == iota_sub).astype(bf16)
         - (col == iota_sub).astype(bf16))                    # (Np, TE) bf16

    # edge_model: x_diff = x[row] - x[col] on the bf16 MXU; hi+lo split of x
    # (done once in the wrapper) keeps ~f32 accuracy.
    x_diff = (jnp.dot(xhi_ref[...], D, preferred_element_type=f32)
              + jnp.dot(xlo_ref[...], D, preferred_element_type=f32))   # (3, TE)

    radial = jnp.sqrt(jnp.sum(x_diff * x_diff, axis=0, keepdims=True))  # (1, TE)

    # phi: Linear(1, nf) -> LeakyReLU(0.2) -> Linear(nf, 1, bias=False) -> Tanh
    w1 = p_ref[:, 0:1]
    b1 = p_ref[:, 1:2]
    w2 = p_ref[:, 2:3]
    h = _leaky(radial * w1 + b1)                              # (NF, TE)
    e_out = jnp.tanh(jnp.sum(h * w2, axis=0, keepdims=True))  # (1, TE)
    m_ij = x_diff * e_out                                     # (3, TE)

    # unsorted_segment_mean numerator/denominator as one matmul.  The one-hot
    # is built directly in (TE, Np) orientation so the MXU sees a natural
    # (8, TE) @ (TE, Np) product (no XLU transpose of an (Np, TE) tile).
    iota_lane = lax.broadcasted_iota(jnp.int32, (1, Np), 1)   # (1, Np)
    ohT = (rowT_ref[...] == iota_lane).astype(bf16)           # (TE, Np) bf16

    m8 = jnp.concatenate(
        [m_ij, jnp.ones((1, TE), f32), jnp.zeros((4, TE), f32)], axis=0)  # (8,TE)
    m_hi = m8.astype(bf16)
    m_lo = (m8 - m_hi.astype(f32)).astype(bf16)
    acc_ref[...] += (jnp.dot(m_hi, ohT, preferred_element_type=f32)
                     + jnp.dot(m_lo, ohT, preferred_element_type=f32))   # (8,Np)


# ------------------------------ finalize kernel ------------------------------
def _finalize_kernel(acc_ref, xT_ref, velT_ref, vnT_ref, p_ref, out_ref):
    # Combine per-core partials, segment mean (count clamped to 1).
    acc = jnp.sum(acc_ref[...], axis=0)                                # (8, TN)
    agg = acc[0:3, :] / jnp.maximum(acc[3:4, :], 1.0)                  # (3, TN)

    # coord_mlp_vel: Linear(1, nf) -> LeakyReLU(0.2) -> Linear(nf, 1)
    wv1 = p_ref[:, 3:4]
    bv1 = p_ref[:, 4:5]
    wv2 = p_ref[:, 5:6]
    bv2 = p_ref[0:1, 6:7]
    vn = vnT_ref[...]                                                  # (1, TN)
    hv = _leaky(vn * wv1 + bv1)                                        # (NF, TN)
    sv = jnp.sum(hv * wv2, axis=0, keepdims=True) + bv2                # (1, TN)

    # x_out = x + agg * coords_weight + vel * coord_mlp_vel(vel_norm)
    out_ref[...] = xT_ref[...] + COORDS_WEIGHT * agg + velT_ref[...] * sv


# --------------------------------- wrapper -----------------------------------
def _round_up(v, m):
    return ((v + m - 1) // m) * m


def _pack_params(params, nf):
    """Pack the 7 tiny parameter tensors into one (nf, 8) f32 array."""
    w1, b1, w2, wv1, bv1, wv2, bv2 = params
    cols = [w1, b1, w2, wv1, bv1, wv2]
    P = jnp.zeros((nf, 8), jnp.float32)
    for j, c in enumerate(cols):
        P = P.at[:, j].set(c.reshape(nf).astype(jnp.float32))
    P = P.at[:, 6].set(jnp.full((nf,), jnp.squeeze(bv2), jnp.float32))
    return P


def _vmem_limit_bytes():
    """Generation-aware VMEM budget (v5e/v6e: 128 MiB, v7x: 64 MiB physical)."""
    try:
        cap = int(pltpu.get_tpu_info().vmem_capacity_bytes)
    except Exception:
        cap = 64 * 1024 * 1024          # conservative fallback: fits every gen
    return int(min(cap * 3 // 4, 100 * 1024 * 1024))


def _auto_edge_tile(np_nodes, n_edges, vmem_budget):
    """Largest edge tile whose (Np,TE)+(TE,Np) bf16 one-hots fit the budget."""
    cap = max(128, (vmem_budget // 3) // (4 * np_nodes))   # 2 arrays * 2 B/elem
    te = min(2048, cap, _round_up(max(n_edges, 1), 128))
    return max(128, (te // 128) * 128)


def _pick_node_tile(np_nodes, max_tile=4096):
    """Largest multiple of 128 that divides Np and is <= max_tile."""
    m = np_nodes // 128
    best = 1
    for d in range(1, min(m, max_tile // 128) + 1):
        if m % d == 0:
            best = d
    return 128 * best


def gcl_rf_vel_forward(x, vel_norm, vel, edge_index, params, edge_attr=None,
                       *, edge_tile=None, num_cores=2):
    """x, vel: (N, 3, 1); vel_norm: (N, 1, 1); edge_index: (2, E) int32."""
    nf = params[0].shape[-1]
    N = x.shape[0]
    E = edge_index.shape[1]

    # Lane multiple of 128; 256 for larger graphs so the 256-wide MXU passes on
    # v6e/v7x are fully filled (costs nothing at that size).
    Np = _round_up(N, 256) if N >= 256 else _round_up(N, 128)

    vmem_budget = _vmem_limit_bytes()
    TE = edge_tile if edge_tile is not None else _auto_edge_tile(Np, E, vmem_budget)

    n_tiles = max(1, -(-E // TE))
    ncores = max(1, min(num_cores, n_tiles))   # 2 partials feed v7x's 2 TCs
    tpc = -(-n_tiles // ncores)                # edge tiles per core
    Ep = ncores * tpc * TE

    f32, bf16 = jnp.float32, jnp.bfloat16

    xT = jnp.pad(x[..., 0].astype(f32).T, ((0, 0), (0, Np - N)))          # (3, Np)
    velT = jnp.pad(vel[..., 0].astype(f32).T, ((0, 0), (0, Np - N)))      # (3, Np)
    vnT = jnp.pad(vel_norm[..., 0].astype(f32).T, ((0, 0), (0, Np - N)))  # (1, Np)

    # hi/lo bf16 split of x (loop-invariant -> done once here, not per tile).
    x_hi = xT.astype(bf16)
    x_lo = (xT - x_hi.astype(f32)).astype(bf16)

    row = jnp.pad(edge_index[0].astype(jnp.int32), (0, Ep - E), constant_values=-1)
    col = jnp.pad(edge_index[1].astype(jnp.int32), (0, Ep - E), constant_values=-1)
    row_l = row.reshape(1, Ep)          # lane-dense copy for the gather indicator
    row_s = row.reshape(Ep, 1)          # sublane-dense copy for the scatter one-hot
    col_l = col.reshape(1, Ep)

    P = _pack_params(params, nf)

    partials = pl.pallas_call(
        _edge_kernel,
        out_shape=jax.ShapeDtypeStruct((ncores, 8, Np), f32),
        grid_spec=pltpu.PrefetchScalarGridSpec(
            num_scalar_prefetch=0,
            grid=(ncores, tpc),
            in_specs=[
                pl.BlockSpec((1, TE), lambda c, e: (0, c * tpc + e)),   # row (lane)
                pl.BlockSpec((TE, 1), lambda c, e: (c * tpc + e, 0)),   # row (sublane)
                pl.BlockSpec((1, TE), lambda c, e: (0, c * tpc + e)),   # col
                pl.BlockSpec((3, Np), lambda c, e: (0, 0)),             # x hi (resident)
                pl.BlockSpec((3, Np), lambda c, e: (0, 0)),             # x lo (resident)
                pl.BlockSpec((nf, 8), lambda c, e: (0, 0)),             # packed params
            ],
            out_specs=pl.BlockSpec((None, 8, Np), lambda c, e: (c, 0, 0)),
        ),
        compiler_params=pltpu.CompilerParams(
            dimension_semantics=("parallel", "arbitrary"),
            vmem_limit_bytes=vmem_budget,
        ),
    )(row_l, row_s, col_l, x_hi, x_lo, P)

    # Tiny node-tiled finalize: combine per-core partials, mean, coord_mlp_vel,
    # residual adds.  Keeps vel / vel_norm out of VMEM during the edge loop.
    TN = _pick_node_tile(Np)
    out = pl.pallas_call(
        _finalize_kernel,
        out_shape=jax.ShapeDtypeStruct((3, Np), f32),
        grid_spec=pltpu.PrefetchScalarGridSpec(
            num_scalar_prefetch=0,
            grid=(Np // TN,),
            in_specs=[
                pl.BlockSpec((ncores, 8, TN), lambda n: (0, 0, n)),
                pl.BlockSpec((3, TN), lambda n: (0, n)),
                pl.BlockSpec((3, TN), lambda n: (0, n)),
                pl.BlockSpec((1, TN), lambda n: (0, n)),
                pl.BlockSpec((nf, 8), lambda n: (0, 0)),
            ],
            out_specs=pl.BlockSpec((3, TN), lambda n: (0, n)),
        ),
        compiler_params=pltpu.CompilerParams(
            dimension_semantics=("parallel",),
            vmem_limit_bytes=vmem_budget,
        ),
    )(partials, xT, velT, vnT, P)

    x_out = out[:, :N].T.reshape(N, 3, 1)
    return x_out, edge_attr


# ------------------------- pure-JAX reference -------------------------------
def reference_forward(x, vel_norm, vel, edge_index, params):
    w1, b1, w2, wv1, bv1, wv2, bv2 = params
    row, col = edge_index[0], edge_index[1]
    xs, vels, vns = x[..., 0], vel[..., 0], vel_norm[..., 0]
    x_diff = xs[row] - xs[col]
    radial = jnp.sqrt(jnp.sum(x_diff ** 2, axis=1, keepdims=True))
    h = _leaky(radial * w1 + b1)
    e_out = jnp.tanh(jnp.sum(h * w2, axis=1, keepdims=True))
    m = x_diff * e_out
    N = xs.shape[0]
    seg = jax.ops.segment_sum(m, row, num_segments=N)
    cnt = jax.ops.segment_sum(jnp.ones_like(m), row, num_segments=N)
    agg = seg / jnp.maximum(cnt, 1.0)
    xo = xs + agg * COORDS_WEIGHT
    hv = _leaky(vns * wv1 + bv1)
    sv = jnp.sum(hv * wv2, axis=1, keepdims=True) + bv2
    xo = xo + vels * sv
    return xo[..., None]


# ------------------------- deterministic params -----------------------------
def init_params(key, nf=NF):
    ks = jax.random.split(key, 7)
    # phi: Linear(1, nf), LeakyReLU, Linear(nf, 1, bias=False, xavier gain=1e-3), Tanh
    w1 = jax.random.uniform(ks[0], (1, nf), jnp.float32, -1.0, 1.0)
    b1 = jax.random.uniform(ks[1], (1, nf), jnp.float32, -1.0, 1.0)
    xav = 1e-3 * (6.0 / (nf + 1)) ** 0.5
    w2 = jax.random.uniform(ks[2], (1, nf), jnp.float32, -xav, xav)
    # coord_mlp_vel: Linear(1, nf), LeakyReLU, Linear(nf, 1)
    wv1 = jax.random.uniform(ks[3], (1, nf), jnp.float32, -1.0, 1.0)
    bv1 = jax.random.uniform(ks[4], (1, nf), jnp.float32, -1.0, 1.0)
    bnd = 1.0 / (nf ** 0.5)
    wv2 = jax.random.uniform(ks[5], (1, nf), jnp.float32, -bnd, bnd)
    bv2 = jax.random.uniform(ks[6], (1, 1), jnp.float32, -bnd, bnd)
    return (w1, b1, w2, wv1, bv1, wv2, bv2)


if __name__ == "__main__":
    key = jax.random.PRNGKey(0)
    k_x, k_v, k_p = jax.random.split(key, 3)

    N = 24                                  # nodes
    x = jax.random.normal(k_x, (N, 3, 1), jnp.float32)
    vel = jax.random.normal(k_v, (N, 3, 1), jnp.float32)
    vel_norm = jnp.sqrt(jnp.sum(vel ** 2, axis=1, keepdims=True))   # (N, 1, 1)

    # fully connected graph without self loops: E = N*(N-1) = 552
    rows, cols = [], []
    for i in range(N):
        for j in range(N):
            if i != j:
                rows.append(i)
                cols.append(j)
    edge_index = jnp.array([rows, cols], dtype=jnp.int32)

    params = init_params(k_p)
    ref = reference_forward(x, vel_norm, vel, edge_index, params)

    # (a) auto edge tile: single tile, single partial accumulator.
    out_a, _ = gcl_rf_vel_forward(x, vel_norm, vel, edge_index, params)
    out_a = jax.block_until_ready(out_a)

    # (b) edge_tile=128 -> grid (2 cores, 3 edge tiles each): exercises the
    #     resident per-core accumulator and the partial-sum combine.
    out_b, _ = gcl_rf_vel_forward(x, vel_norm, vel, edge_index, params,
                                  edge_tile=128)
    out_b = jax.block_until_ready(out_b)

    for out in (out_a, out_b):
        assert out.shape == (N, 3, 1)
        err = jnp.max(jnp.abs(out - ref))
        assert jnp.allclose(out, ref, rtol=1e-4, atol=1e-4), (
            f"max abs err = {err}")

    print("KERNEL_OK")
</pallas_src>

<mosaic_0001>
module attributes {stable_mosaic.version = 11 : i64} {
  func.func @_edge_kernel(%arg0: i32, %arg1: i32, %arg2: memref<1x640xi32, #tpu.memory_space<vmem>>, %arg3: memref<640x1xi32, #tpu.memory_space<vmem>>, %arg4: memref<1x640xi32, #tpu.memory_space<vmem>>, %arg5: memref<3x128xbf16, #tpu.memory_space<vmem>>, %arg6: memref<3x128xbf16, #tpu.memory_space<vmem>>, %arg7: memref<32x8xf32, #tpu.memory_space<vmem>>, %arg8: memref<1x8x128xf32, #tpu.memory_space<vmem>>) attributes {dimension_semantics = [#tpu.dimension_semantics<parallel>, #tpu.dimension_semantics<arbitrary>], iteration_bounds = array<i64: 1, 1>, scalar_prefetch = 0 : i64, scratch_operands = 0 : i64, tpu.core_type = #tpu.core_type<tc>, window_params = [{transform_indices = @transform_0, window_bounds = array<i64: 1, 640>}, {transform_indices = @transform_1, window_bounds = array<i64: 640, 1>}, {transform_indices = @transform_2, window_bounds = array<i64: 1, 640>}, {pipeline_mode = #tpu.pipeline_mode<synchronous>, transform_indices = @transform_3, window_bounds = array<i64: 3, 128>}, {pipeline_mode = #tpu.pipeline_mode<synchronous>, transform_indices = @transform_4, window_bounds = array<i64: 3, 128>}, {pipeline_mode = #tpu.pipeline_mode<synchronous>, transform_indices = @transform_5, window_bounds = array<i64: 32, 8>}, {transform_indices = @transform_6, window_bounds = array<i64: 1, 8, 128>}]} {
    %c0_i32 = arith.constant 0 : i32
    %0 = arith.cmpi eq, %arg1, %c0_i32 : i32
    %1 = arith.extui %0 : i1 to i32
    %c0_i32_0 = arith.constant 0 : i32
    %2 = arith.cmpi ne, %1, %c0_i32_0 : i32
    scf.if %2 {
      %cst_29 = arith.constant 0.000000e+00 : f32
      %72 = vector.broadcast %cst_29 : f32 to vector<8x128xf32>
      %c0_30 = arith.constant 0 : index
      %c0_31 = arith.constant 0 : index
      %c0_32 = arith.constant 0 : index
      %73 = vector.load %arg8[%c0_30, %c0_31, %c0_32] : memref<1x8x128xf32, #tpu.memory_space<vmem>>, vector<1x8x128xf32>
      %74 = vector.shape_cast %73 : vector<1x8x128xf32> to vector<8x128xf32>
      %75 = vector.shape_cast %72 : vector<8x128xf32> to vector<1x8x128xf32>
      tpu.vector_store %arg8[%c0_30, %c0_31, %c0_32], %75 {strides = array<i32>} : memref<1x8x128xf32, #tpu.memory_space<vmem>>, vector<1x8x128xf32>,
    } else {
    }
    %c0 = arith.constant 0 : index
    %c0_1 = arith.constant 0 : index
    %3 = vector.load %arg2[%c0, %c0_1] : memref<1x640xi32, #tpu.memory_space<vmem>>, vector<1x640xi32>
    %c0_2 = arith.constant 0 : index
    %c0_3 = arith.constant 0 : index
    %4 = vector.load %arg4[%c0_2, %c0_3] : memref<1x640xi32, #tpu.memory_space<vmem>>, vector<1x640xi32>
    %5 = tpu.iota {dimensions = array<i32: 0>} : vector<128x1xi32>
    %6 = vector.broadcast %3 : vector<1x640xi32> to vector<128x640xi32>
    %7 = vector.broadcast %5 : vector<128x1xi32> to vector<128x640xi32>
    %8 = arith.cmpi eq, %6, %7 : vector<128x640xi32>
    %9 = arith.extui %8 : vector<128x640xi1> to vector<128x640xi32>
    %10 = arith.sitofp %9 : vector<128x640xi32> to vector<128x640xf32>
    %11 = arith.truncf %10 : vector<128x640xf32> to vector<128x640xbf16>
    %12 = vector.broadcast %4 : vector<1x640xi32> to vector<128x640xi32>
    %13 = vector.broadcast %5 : vector<128x1xi32> to vector<128x640xi32>
    %14 = arith.cmpi eq, %12, %13 : vector<128x640xi32>
    %15 = arith.extui %14 : vector<128x640xi1> to vector<128x640xi32>
    %16 = arith.sitofp %15 : vector<128x640xi32> to vector<128x640xf32>
    %17 = arith.truncf %16 : vector<128x640xf32> to vector<128x640xbf16>
    %18 = arith.subf %11, %17 : vector<128x640xbf16>
    %c0_4 = arith.constant 0 : index
    %c0_5 = arith.constant 0 : index
    %19 = vector.load %arg5[%c0_4, %c0_5] : memref<3x128xbf16, #tpu.memory_space<vmem>>, vector<3x128xbf16>
    %cst = arith.constant dense<0.000000e+00> : vector<3x640xf32>
    %20 = tpu.matmul %19, %18, %cst {dimension_numbers = #tpu.dot_dimension_numbers<[1], [0], [0], [1], [0, 0, 1, 1], [], []>} : vector<3x128xbf16>, vector<128x640xbf16>, vector<3x640xf32> -> vector<3x640xf32>
    %c0_6 = arith.constant 0 : index
    %c0_7 = arith.constant 0 : index
    %21 = vector.load %arg6[%c0_6, %c0_7] : memref<3x128xbf16, #tpu.memory_space<vmem>>, vector<3x128xbf16>
    %cst_8 = arith.constant dense<0.000000e+00> : vector<3x640xf32>
    %22 = tpu.matmul %21, %18, %cst_8 {dimension_numbers = #tpu.dot_dimension_numbers<[1], [0], [0], [1], [0, 0, 1, 1], [], []>} : vector<3x128xbf16>, vector<128x640xbf16>, vector<3x640xf32> -> vector<3x640xf32>
    %23 = arith.addf %20, %22 : vector<3x640xf32>
    %24 = arith.mulf %23, %23 : vector<3x640xf32>
    %cst_9 = arith.constant dense<0.000000e+00> : vector<640xf32>
    %25 = vector.multi_reduction <add>, %24, %cst_9 [0] : vector<3x640xf32> to vector<640xf32>
    %26 = vector.shape_cast %25 : vector<640xf32> to vector<1x640xf32>
    %27 = math.sqrt %26 : vector<1x640xf32>
    %c0_10 = arith.constant 0 : index
    %c0_11 = arith.constant 0 : index
    %28 = vector.load %arg7[%c0_10, %c0_11] : memref<32x8xf32, #tpu.memory_space<vmem>>, vector<32x1xf32>
    %c0_12 = arith.constant 0 : index
    %c1 = arith.constant 1 : index
    %29 = vector.load %arg7[%c0_12, %c1] : memref<32x8xf32, #tpu.memory_space<vmem>>, vector<32x1xf32>
    %c0_13 = arith.constant 0 : index
    %c2 = arith.constant 2 : index
    %30 = vector.load %arg7[%c0_13, %c2] : memref<32x8xf32, #tpu.memory_space<vmem>>, vector<32x1xf32>
    %31 = vector.broadcast %27 : vector<1x640xf32> to vector<32x640xf32>
    %32 = vector.broadcast %28 : vector<32x1xf32> to vector<32x640xf32>
    %33 = arith.mulf %31, %32 : vector<32x640xf32>
    %34 = vector.broadcast %29 : vector<32x1xf32> to vector<32x640xf32>
    %35 = arith.addf %33, %34 : vector<32x640xf32>
    %cst_14 = arith.constant 0.000000e+00 : f32
    %36 = vector.broadcast %cst_14 : f32 to vector<32x640xf32>
    %37 = arith.cmpf ogt, %35, %36 : vector<32x640xf32>
    %cst_15 = arith.constant 2.000000e-01 : f32
    %38 = vector.broadcast %cst_15 : f32 to vector<32x640xf32>
    %39 = arith.mulf %38, %35 : vector<32x640xf32>
    %40 = arith.select %37, %35, %39 : vector<32x640xi1>, vector<32x640xf32>
    %41 = vector.broadcast %30 : vector<32x1xf32> to vector<32x640xf32>
    %42 = arith.mulf %40, %41 : vector<32x640xf32>
    %cst_16 = arith.constant dense<0.000000e+00> : vector<640xf32>
    %43 = vector.multi_reduction <add>, %42, %cst_16 [0] : vector<32x640xf32> to vector<640xf32>
    %44 = vector.shape_cast %43 : vector<640xf32> to vector<1x640xf32>
    %45 = math.tanh %44 : vector<1x640xf32>
    %46 = vector.broadcast %45 : vector<1x640xf32> to vector<3x640xf32>
    %47 = arith.mulf %23, %46 : vector<3x640xf32>
    %48 = tpu.iota {dimensions = array<i32: 1>} : vector<1x128xi32>
    %c0_17 = arith.constant 0 : index
    %c0_18 = arith.constant 0 : index
    %49 = vector.load %arg3[%c0_17, %c0_18] : memref<640x1xi32, #tpu.memory_space<vmem>>, vector<640x1xi32>
    %50 = vector.broadcast %49 : vector<640x1xi32> to vector<640x128xi32>
    %51 = vector.broadcast %48 : vector<1x128xi32> to vector<640x128xi32>
    %52 = arith.cmpi eq, %50, %51 : vector<640x128xi32>
    %53 = arith.extui %52 : vector<640x128xi1> to vector<640x128xi32>
    %54 = arith.sitofp %53 : vector<640x128xi32> to vector<640x128xf32>
    %55 = arith.truncf %54 : vector<640x128xf32> to vector<640x128xbf16>
    %cst_19 = arith.constant 1.000000e+00 : f32
    %56 = vector.broadcast %cst_19 : f32 to vector<1x640xf32>
    %cst_20 = arith.constant 0.000000e+00 : f32
    %57 = vector.broadcast %cst_20 : f32 to vector<4x640xf32>
    %58 = tpu.concatenate %47, %56, %57 in 0 : vector<3x640xf32>, vector<1x640xf32>, vector<4x640xf32> -> vector<8x640xf32>
    %59 = arith.truncf %58 : vector<8x640xf32> to vector<8x640xbf16>
    %60 = arith.extf %59 : vector<8x640xbf16> to vector<8x640xf32>
    %61 = arith.subf %58, %60 : vector<8x640xf32>
    %62 = arith.truncf %61 : vector<8x640xf32> to vector<8x640xbf16>
    %c0_21 = arith.constant 0 : index
    %c0_22 = arith.constant 0 : index
    %c0_23 = arith.constant 0 : index
    %63 = vector.load %arg8[%c0_21, %c0_22, %c0_23] : memref<1x8x128xf32, #tpu.memory_space<vmem>>, vector<1x8x128xf32>
    %64 = vector.shape_cast %63 : vector<1x8x128xf32> to vector<8x128xf32>
    %cst_24 = arith.constant dense<0.000000e+00> : vector<8x128xf32>
    %65 = tpu.matmul %59, %55, %cst_24 {dimension_numbers = #tpu.dot_dimension_numbers<[1], [0], [0], [1], [0, 0, 1, 1], [], []>} : vector<8x640xbf16>, vector<640x128xbf16>, vector<8x128xf32> -> vector<8x128xf32>
    %cst_25 = arith.constant dense<0.000000e+00> : vector<8x128xf32>
    %66 = tpu.matmul %62, %55, %cst_25 {dimension_numbers = #tpu.dot_dimension_numbers<[1], [0], [0], [1], [0, 0, 1, 1], [], []>} : vector<8x640xbf16>, vector<640x128xbf16>, vector<8x128xf32> -> vector<8x128xf32>
    %67 = arith.addf %65, %66 : vector<8x128xf32>
    %68 = arith.addf %64, %67 : vector<8x128xf32>
    %c0_26 = arith.constant 0 : index
    %c0_27 = arith.constant 0 : index
    %c0_28 = arith.constant 0 : index
    %69 = vector.load %arg8[%c0_26, %c0_27, %c0_28] : memref<1x8x128xf32, #tpu.memory_space<vmem>>, vector<1x8x128xf32>
    %70 = vector.shape_cast %69 : vector<1x8x128xf32> to vector<8x128xf32>
    %71 = vector.shape_cast %68 : vector<8x128xf32> to vector<1x8x128xf32>
    tpu.vector_store %arg8[%c0_26, %c0_27, %c0_28], %71 {strides = array<i32>} : memref<1x8x128xf32, #tpu.memory_space<vmem>>, vector<1x8x128xf32>,
    return
  }
  func.func @transform_0(%arg0: i32, %arg1: i32) -> (i32, i32) {
    %c1_i32 = arith.constant 1 : i32
    %0 = arith.muli %arg0, %c1_i32 : i32
    %1 = arith.addi %0, %arg1 : i32
    %c0_i32 = arith.constant 0 : i32
    %c0_i32_0 = arith.constant 0 : i32
    return %c0_i32, %1 : i32, i32
  }
  func.func @transform_1(%arg0: i32, %arg1: i32) -> (i32, i32) {
    %c1_i32 = arith.constant 1 : i32
    %0 = arith.muli %arg0, %c1_i32 : i32
    %1 = arith.addi %0, %arg1 : i32
    %c0_i32 = arith.constant 0 : i32
    %c0_i32_0 = arith.constant 0 : i32
    return %1, %c0_i32 : i32, i32
  }
  func.func @transform_2(%arg0: i32, %arg1: i32) -> (i32, i32) {
    %c1_i32 = arith.constant 1 : i32
    %0 = arith.muli %arg0, %c1_i32 : i32
    %1 = arith.addi %0, %arg1 : i32
    %c0_i32 = arith.constant 0 : i32
    %c0_i32_0 = arith.constant 0 : i32
    return %c0_i32, %1 : i32, i32
  }
  func.func @transform_3(%arg0: i32, %arg1: i32) -> (i32, i32) {
    %c0_i32 = arith.constant 0 : i32
    %c0_i32_0 = arith.constant 0 : i32
    %c0_i32_1 = arith.constant 0 : i32
    return %c0_i32, %c0_i32_0 : i32, i32
  }
  func.func @transform_4(%arg0: i32, %arg1: i32) -> (i32, i32) {
    %c0_i32 = arith.constant 0 : i32
    %c0_i32_0 = arith.constant 0 : i32
    %c0_i32_1 = arith.constant 0 : i32
    return %c0_i32, %c0_i32_0 : i32, i32
  }
  func.func @transform_5(%arg0: i32, %arg1: i32) -> (i32, i32) {
    %c0_i32 = arith.constant 0 : i32
    %c0_i32_0 = arith.constant 0 : i32
    %c0_i32_1 = arith.constant 0 : i32
    return %c0_i32, %c0_i32_0 : i32, i32
  }
  func.func @transform_6(%arg0: i32, %arg1: i32) -> (i32, i32, i32) {
    %c0_i32 = arith.constant 0 : i32
    %c0_i32_0 = arith.constant 0 : i32
    %c0_i32_1 = arith.constant 0 : i32
    return %arg0, %c0_i32, %c0_i32_0 : i32, i32, i32
  }
}

</mosaic_0001>

<bundles_post_ra>
// kernel: tpu_custom_call.1
= control target key start
LH: loop header
LB: loop body
LE: loop exit
PB: predicated region body
PF: predicated region fallthrough
CT: control target
= control target key end

     0   :  { %v4584_v2 = vlaneseq  ;;  %v2710_v3 = vmov 1   ;;  %v2711_v6 = vmov 0   ;;  %s4577_s0 = inlined_call_operand.vmem [shape: s32[1,640], index: 0, kind: input, shape index: {}]   ;;  %s4578_s1 = inlined_call_operand.vmem [shape: s32[640,1], index: 1, kind: input, shape index: {}]   ;;  %s4579_s2 = inlined_call_operand.vmem [shape: s32[1,640], index: 2, kind: input, shape index: {}]   ;;  %s4580_s3 = inlined_call_operand.vmem [shape: bf16[3,128], index: 3, kind: input, shape index: {}]   ;;  %s4581_s4 = inlined_call_operand.vmem [shape: bf16[3,128], index: 4, kind: input, shape index: {}]   ;;  %s4582_s5 = inlined_call_operand.vmem [shape: f32[32,8], index: 5, kind: input, shape index: {}]   ;;  %s4583_s6 = inlined_call_operand.hbm [shape: f32[1,8,128], index: 6, kind: output, shape index: {}]  }
   0x1   :  { %v2754_v0 = vld [vmem:[%s4582_s5 + $0x10] sm:$0xff]  ;;  %v2759_v1 = vld [vmem:[%s4582_s5] sm:$0xff]  ;;  %2656 = vset.pattern.permute.xlu0 %v2710_v3  ;;  %2655 = vset.pattern.permute.xlu2 %v2710_v3 }
   0x2   :  { %v2766_v4 = vld [vmem:[%s4577_s0] sm:$0x1f]  ;;  %2654 = vset.pattern.permute.xlu1 %v2711_v6  ;;  %1260 = vperm.xlu0 %2656, %v2754_v0   ;;  %v2776_v7 = vshrl.u32 %v4584_v2, 7 }
   0x3   :  { %v2771_v5 = vld [vmem:[%s4579_s2] sm:$0x1f]  ;;  %v2779_v8 = vperm.slane %v2766_v4, 0 }
   0x4   :  { %v2782_v9 = vperm.slane %v2771_v5, 0 }
   0x5   :  { %11 = vsyncpa [#allocation3], 0  ;;  %1223 = vperm.xlu1 %2654, %v2754_v0   ;;  %1252 = vperm.xlu2 %2655, %v2759_v1   ;;  %v2787_v10 = vperm.slane %v2766_v4, 1  ;;  %v2790_v11 = vperm.slane %v2771_v5, 1  ;;  %v2793_v12 = vperm.slane %v2766_v4, 2  ;;  %v2796_v13 = vperm.slane %v2771_v5, 2 }
   0x6   :  { %v2799_v14 = vadd.s32 112, %v2776_v7  ;;  %v2802_v15 = vadd.s32 120, %v2776_v7  ;;  %v2805_v16 = vperm.slane %v2766_v4, 3  ;;  %v2808_v17 = vperm.slane %v2771_v5, 3  ;;  %v2837_v27 = vld [vmem:[%s4582_s5 + $0x18] sm:$0xff]  ;;  %v2842_v28 = vld [vmem:[%s4582_s5 + $0x8] sm:$0xff] }
   0x7   :  { %v2811_v18 = vadd.s32 96, %v2776_v7  ;;  %v2814_v19 = vadd.s32 104, %v2776_v7  ;;  %v2817_v20 = vadd.s32 80, %v2776_v7  ;;  %v2820_v21 = vadd.s32 88, %v2776_v7  ;;  %s2227_s0 = sshll.u32 %s4583_s6, 4  ;;  %s2228_s0 = int_to_ptr.hbm [resolvable:$true] %s2227_s0 }
   0x8   :  { %vm183_vm0 = vcmp.eq.s32.totalorder %v2779_v8, %v2799_v14  ;;  %vm188_vm1 = vcmp.eq.s32.totalorder %v2779_v8, %v2802_v15  ;;  %vm476_vm2 = vcmp.eq.s32.totalorder %v2782_v9, %v2799_v14  ;;  %vm481_vm3 = vcmp.eq.s32.totalorder %v2782_v9, %v2802_v15 }
   0x9   :  { %v2712_v22 = vmov 0.0   ;;  %vm184_vm4 = vcmp.eq.s32.totalorder %v2787_v10, %v2799_v14  ;;  %vm189_vm5 = vcmp.eq.s32.totalorder %v2787_v10, %v2802_v15  ;;  %vm477_vm6 = vcmp.eq.s32.totalorder %v2790_v11, %v2799_v14 }
   0xa   :  { %v2318_v23 = vsel %vm183_vm0, 1.0, %v2712_v22  ;;  %v2323_v24 = vsel %vm188_vm1, 1.0, %v2712_v22  ;;  %v2398_v25 = vsel %vm476_vm2, 1.0, %v2712_v22  ;;  %v2403_v26 = vsel %vm481_vm3, 1.0, %v2712_v22 }
   0xb   :  { %v924_v29 = vsub.f32 %v2318_v23, %v2398_v25  ;;  %v929_v30 = vsub.f32 %v2323_v24, %v2403_v26  ;;  %v2319_v31 = vsel %vm184_vm4, 1.0, %v2712_v22  ;;  %v2324_v32 = vsel %vm189_vm5, 1.0, %v2712_v22 }
   0xc   :  { %vm482_vm7 = vcmp.eq.s32.totalorder %v2790_v11, %v2802_v15  ;;  %v2713_v33 = vmov 2   ;;  %v2399_v35 = vsel %vm477_vm6, 1.0, %v2712_v22  ;;  %vm185_vm8 = vcmp.eq.s32.totalorder %v2793_v12, %v2799_v14 }
   0xd   :  { %2660 = vset.pattern.permute.xlu0 %v2713_v33  ;;  %v2855_v34 = vpack.c.bf16 %v929_v30, %v924_v29  ;;  %v2404_v36 = vsel %vm482_vm7, 1.0, %v2712_v22  ;;  %1228 = vperm.xlu1 %2654, %v2837_v27   ;;  %v925_v37 = vsub.f32 %v2319_v31, %v2399_v35  ;;  %vm190_vm9 = vcmp.eq.s32.totalorder %v2793_v12, %v2802_v15 }
   0xe   :  { %1256 = vperm.xlu2 %2655, %v2842_v28   ;;  %v930_v38 = vsub.f32 %v2324_v32, %v2404_v36  ;;  %v2320_v39 = vsel %vm185_vm8, 1.0, %v2712_v22  ;;  %1360 = vperm.xlu0 %2660, %v2837_v27   ;;  %v2325_v40 = vsel %vm190_vm9, 1.0, %v2712_v22  ;;  %vm478_vm10 = vcmp.eq.s32.totalorder %v2796_v13, %v2799_v14 }
   0xf   :  { %976 = vmatpush.bf16.msra.mxu0 %v2855_v34  ;;  %vm483_vm11 = vcmp.eq.s32.totalorder %v2796_v13, %v2802_v15  ;;  %vm186_vm12 = vcmp.eq.s32.totalorder %v2805_v16, %v2799_v14  ;;  %v2400_v42 = vsel %vm478_vm10, 1.0, %v2712_v22  ;;  %vm191_vm13 = vcmp.eq.s32.totalorder %v2805_v16, %v2802_v15 }
  0x10   :  { %v2875_v41 = vpack.c.bf16 %v930_v38, %v925_v37  ;;  %v2405_v43 = vsel %vm483_vm11, 1.0, %v2712_v22  ;;  %v926_v44 = vsub.f32 %v2320_v39, %v2400_v42  ;;  %v2321_v46 = vsel %vm186_vm12, 1.0, %v2712_v22 }
  0x11   :  { %v931_v45 = vsub.f32 %v2325_v40, %v2405_v43  ;;  %v2326_v47 = vsel %vm191_vm13, 1.0, %v2712_v22  ;;  %vm479_vm14 = vcmp.eq.s32.totalorder %v2808_v17, %v2799_v14  ;;  %vm484_vm15 = vcmp.eq.s32.totalorder %v2808_v17, %v2802_v15 }
  0x12   :  { %989 = vmatpush.bf16.msra.mxu1 %v2875_v41  ;;  %vm173_vm0 = vcmp.eq.s32.totalorder %v2779_v8, %v2811_v18  ;;  %vm178_vm1 = vcmp.eq.s32.totalorder %v2779_v8, %v2814_v19  ;;  %v2401_v49 = vsel %vm479_vm14, 1.0, %v2712_v22  ;;  %v2406_v50 = vsel %vm484_vm15, 1.0, %v2712_v22 }
  0x13   :  { %v2892_v48 = vpack.c.bf16 %v931_v45, %v926_v44  ;;  %v2308_v51 = vsel %vm173_vm0, 1.0, %v2712_v22  ;;  %v927_v52 = vsub.f32 %v2321_v46, %v2401_v49  ;;  %v932_v53 = vsub.f32 %v2326_v47, %v2406_v50 }
  0x14   :  { %v2313_v54 = vsel %vm178_vm1, 1.0, %v2712_v22  ;;  %vm466_vm2 = vcmp.eq.s32.totalorder %v2782_v9, %v2811_v18  ;;  %vm471_vm3 = vcmp.eq.s32.totalorder %v2782_v9, %v2814_v19  ;;  %vm174_vm4 = vcmp.eq.s32.totalorder %v2787_v10, %v2811_v18 }
  0x15   :  { %1002 = vmatpush.bf16.msra.mxu2 %v2892_v48  ;;  %v2388_v55 = vsel %vm466_vm2, 1.0, %v2712_v22  ;;  %vm179_vm5 = vcmp.eq.s32.totalorder %v2787_v10, %v2814_v19  ;;  %v2908_v56 = vpack.c.bf16 %v932_v53, %v927_v52  ;;  %v2393_v57 = vsel %vm471_vm3, 1.0, %v2712_v22  ;;  %2657 = vset.pattern.permute.xlu1 %v2710_v3 }
  0x16   :  { %v914_v58 = vsub.f32 %v2308_v51, %v2388_v55  ;;  %v2309_v59 = vsel %vm174_vm4, 1.0, %v2712_v22  ;;  %2658 = vset.pattern.permute.xlu2 %v2713_v33  ;;  %v919_v60 = vsub.f32 %v2313_v54, %v2393_v57  ;;  %v2314_v61 = vsel %vm179_vm5, 1.0, %v2712_v22  ;;  %2661 = vset.pattern.permute.xlu0 %v2711_v6 }
  0x17   :  { %vm467_vm6 = vcmp.eq.s32.totalorder %v2790_v11, %v2811_v18  ;;  %vm472_vm7 = vcmp.eq.s32.totalorder %v2790_v11, %v2814_v19  ;;  %1264 = vperm.xlu1 %2657, %v2837_v27   ;;  %1015 = vmatpush.bf16.msra.mxu3 %v2908_v56  ;;  %vm175_vm8 = vcmp.eq.s32.totalorder %v2793_v12, %v2811_v18 }
  0x18   :  { %v2389_v62 = vsel %vm467_vm6, 1.0, %v2712_v22  ;;  %v2394_v63 = vsel %vm472_vm7, 1.0, %v2712_v22  ;;  %vm180_vm9 = vcmp.eq.s32.totalorder %v2793_v12, %v2814_v19  ;;  %1348 = vperm.xlu2 %2658, %v2759_v1   ;;  %v2929_v3 = vpack.c.bf16 %v919_v60, %v914_v58  ;;  %1213 = vperm.xlu0 %2661, %v2759_v1  }
  0x19   :  { %v915_v23 = vsub.f32 %v2309_v59, %v2389_v62  ;;  %v920_v24 = vsub.f32 %v2314_v61, %v2394_v63  ;;  %v2310_v25 = vsel %vm175_vm8, 1.0, %v2712_v22  ;;  %v2315_v26 = vsel %vm180_vm9, 1.0, %v2712_v22 }
  0x1a   :  { %vm468_vm10 = vcmp.eq.s32.totalorder %v2796_v13, %v2811_v18  ;;  %vm473_vm11 = vcmp.eq.s32.totalorder %v2796_v13, %v2814_v19  ;;  %vm176_vm12 = vcmp.eq.s32.totalorder %v2805_v16, %v2811_v18  ;;  %977 = vmatpush.bf16.msra.mxu0 %v2929_v3  ;;  %vm181_vm13 = vcmp.eq.s32.totalorder %v2805_v16, %v2814_v19 }
  0x1b   :  { %v2941_v27 = vpack.c.bf16 %v920_v24, %v915_v23  ;;  %v2390_v29 = vsel %vm468_vm10, 1.0, %v2712_v22  ;;  %v2395_v30 = vsel %vm473_vm11, 1.0, %v2712_v22  ;;  %v2311_v32 = vsel %vm176_vm12, 1.0, %v2712_v22 }
  0x1c   :  { %v916_v1 = vsub.f32 %v2310_v25, %v2390_v29  ;;  %v921_v31 = vsub.f32 %v2315_v26, %v2395_v30  ;;  %v2316_v35 = vsel %vm181_vm13, 1.0, %v2712_v22  ;;  %vm469_vm14 = vcmp.eq.s32.totalorder %v2808_v17, %v2811_v18 }
  0x1d   :  { %990 = vmatpush.bf16.msra.mxu1 %v2941_v27  ;;  %vm474_vm15 = vcmp.eq.s32.totalorder %v2808_v17, %v2814_v19  ;;  %vm163_vm0 = vcmp.eq.s32.totalorder %v2779_v8, %v2817_v20  ;;  %vm168_vm1 = vcmp.eq.s32.totalorder %v2779_v8, %v2820_v21  ;;  %v2391_v37 = vsel %vm469_vm14, 1.0, %v2712_v22 }
  0x1e   :  { %v2958_v36 = vpack.c.bf16 %v921_v31, %v916_v1  ;;  %v2396_v38 = vsel %vm474_vm15, 1.0, %v2712_v22  ;;  %v2298_v39 = vsel %vm163_vm0, 1.0, %v2712_v22  ;;  %v917_v40 = vsub.f32 %v2311_v32, %v2391_v37 }
  0x1f   :  { %v922_v42 = vsub.f32 %v2316_v35, %v2396_v38  ;;  %v2303_v43 = vsel %vm168_vm1, 1.0, %v2712_v22  ;;  %vm456_vm2 = vcmp.eq.s32.totalorder %v2782_v9, %v2817_v20  ;;  %2659 = vset.pattern.permute.xlu1 %v2713_v33  ;;  %vm461_vm3 = vcmp.eq.s32.totalorder %v2782_v9, %v2820_v21 }
  0x20   :  { %1003 = vmatpush.bf16.msra.mxu2 %v2958_v36  ;;  %v2378_v44 = vsel %vm456_vm2, 1.0, %v2712_v22  ;;  %vm164_vm4 = vcmp.eq.s32.totalorder %v2787_v10, %v2817_v20  ;;  %vm169_vm5 = vcmp.eq.s32.totalorder %v2787_v10, %v2820_v21  ;;  %1356 = vperm.xlu2 %2658, %v2754_v0   ;;  %v2383_v46 = vsel %vm461_vm3, 1.0, %v2712_v22 }
  0x21   :  { %v2976_v45 = vpack.c.bf16 %v922_v42, %v917_v40  ;;  %v904_v33 = vsub.f32 %v2298_v39, %v2378_v44  ;;  %v2299_v47 = vsel %vm164_vm4, 1.0, %v2712_v22  ;;  %1352 = vperm.xlu1 %2659, %v2842_v28   ;;  %1218 = vperm.xlu0 %2661, %v2842_v28   ;;  %v909_v49 = vsub.f32 %v2303_v43, %v2383_v46 }
  0x22   :  { %v2304_v50 = vsel %vm169_vm5, 1.0, %v2712_v22  ;;  %vm457_vm6 = vcmp.eq.s32.totalorder %v2790_v11, %v2817_v20  ;;  %vm462_vm7 = vcmp.eq.s32.totalorder %v2790_v11, %v2820_v21  ;;  %vm165_vm8 = vcmp.eq.s32.totalorder %v2793_v12, %v2817_v20 }
  0x23   :  { %1016 = vmatpush.bf16.msra.mxu3 %v2976_v45  ;;  %v2379_v0 = vsel %vm457_vm6, 1.0, %v2712_v22  ;;  %v2384_v51 = vsel %vm462_vm7, 1.0, %v2712_v22  ;;  %vm170_vm9 = vcmp.eq.s32.totalorder %v2793_v12, %v2820_v21  ;;  %v2994_v28 = vpack.c.bf16 %v909_v49, %v904_v33 }
  0x24   :  { %v905_v52 = vsub.f32 %v2299_v47, %v2379_v0  ;;  %v910_v53 = vsub.f32 %v2304_v50, %v2384_v51  ;;  %v2300_v54 = vsel %vm165_vm8, 1.0, %v2712_v22  ;;  %v2305_v55 = vsel %vm170_vm9, 1.0, %v2712_v22  ;;  %v1444_v51 = vld [vmem:[%s4578_s1 + $0x20] sm:$0xff] }
  0x25   :  { %vm458_vm10 = vcmp.eq.s32.totalorder %v2796_v13, %v2817_v20  ;;  %vm463_vm11 = vcmp.eq.s32.totalorder %v2796_v13, %v2820_v21  ;;  %vm166_vm12 = vcmp.eq.s32.totalorder %v2805_v16, %v2817_v20  ;;  %978 = vmatpush.bf16.msra.mxu0 %v2994_v28  ;;  %vm171_vm13 = vcmp.eq.s32.totalorder %v2805_v16, %v2820_v21 }
  0x26   :  { %v3005_v57 = vpack.c.bf16 %v910_v53, %v905_v52  ;;  %v2380_v58 = vsel %vm458_vm10, 1.0, %v2712_v22  ;;  %v2385_v59 = vsel %vm463_vm11, 1.0, %v2712_v22  ;;  %v2301_v62 = vsel %vm166_vm12, 1.0, %v2712_v22  ;;  %v1441_v52 = vld [vmem:[%s4578_s1 + $0x8] sm:$0xff] }
  0x27   :  { %v906_v60 = vsub.f32 %v2300_v54, %v2380_v58  ;;  %v911_v61 = vsub.f32 %v2305_v55, %v2385_v59  ;;  %v2306_v63 = vsel %vm171_vm13, 1.0, %v2712_v22  ;;  %vm459_vm14 = vcmp.eq.s32.totalorder %v2808_v17, %v2817_v20 }
  0x28   :  { %991 = vmatpush.bf16.msra.mxu1 %v3005_v57  ;;  %vm464_vm15 = vcmp.eq.s32.totalorder %v2808_v17, %v2820_v21  ;;  %v3019_v23 = vadd.s32 64, %v2776_v7  ;;  %v3022_v24 = vadd.s32 72, %v2776_v7  ;;  %2663 = vset.pattern.permute.xlu2 %v2711_v6  ;;  %v2381_v26 = vsel %vm459_vm14, 1.0, %v2712_v22 }
  0x29   :  { %v3025_v25 = vpack.c.bf16 %v911_v61, %v906_v60  ;;  %v2386_v29 = vsel %vm464_vm15, 1.0, %v2712_v22  ;;  %v3030_v30 = vadd.s32 48, %v2776_v7  ;;  %2662 = vset.pattern.permute.xlu1 %v2711_v6  ;;  %v907_v1 = vsub.f32 %v2301_v62, %v2381_v26  ;;  %1533 = vperm.xlu0 %2661, %v1444_v51  }
  0x2a   :  { %v912_v31 = vsub.f32 %v2306_v63, %v2386_v29  ;;  %vm153_vm0 = vcmp.eq.s32.totalorder %v2779_v8, %v3019_v23  ;;  %vm158_vm1 = vcmp.eq.s32.totalorder %v2779_v8, %v3022_v24  ;;  %vm446_vm2 = vcmp.eq.s32.totalorder %v2782_v9, %v3019_v23  ;;  %1524 = vperm.xlu2 %2663, %v1441_v52  }
  0x2b   :  { %1004 = vmatpush.bf16.msra.mxu2 %v3025_v25  ;;  %v2288_v32 = vsel %vm153_vm0, 1.0, %v2712_v22  ;;  %v2293_v35 = vsel %vm158_vm1, 1.0, %v2712_v22  ;;  %vm451_vm3 = vcmp.eq.s32.totalorder %v2782_v9, %v3022_v24  ;;  %v2368_v37 = vsel %vm446_vm2, 1.0, %v2712_v22 }
  0x2c   :  { %v3044_v6 = vpack.c.bf16 %v912_v31, %v907_v1  ;;  %v2373_v38 = vsel %vm451_vm3, 1.0, %v2712_v22  ;;  %vm154_vm4 = vcmp.eq.s32.totalorder %v2787_v10, %v3019_v23  ;;  %v894_v39 = vsub.f32 %v2288_v32, %v2368_v37 }
  0x2d   :  { %v899_v40 = vsub.f32 %v2293_v35, %v2373_v38  ;;  %vm159_vm5 = vcmp.eq.s32.totalorder %v2787_v10, %v3022_v24  ;;  %v2289_v42 = vsel %vm154_vm4, 1.0, %v2712_v22  ;;  %vm447_vm6 = vcmp.eq.s32.totalorder %v2790_v11, %v3019_v23 }
  0x2e   :  { %1017 = vmatpush.bf16.msra.mxu3 %v3044_v6  ;;  %v2294_v43 = vsel %vm159_vm5, 1.0, %v2712_v22  ;;  %vm452_vm7 = vcmp.eq.s32.totalorder %v2790_v11, %v3022_v24  ;;  %vm155_vm8 = vcmp.eq.s32.totalorder %v2793_v12, %v3019_v23  ;;  %v2369_v46 = vsel %vm447_vm6, 1.0, %v2712_v22 }
  0x2f   :  { %v3061_v44 = vpack.c.bf16 %v899_v40, %v894_v39  ;;  %v2374_v33 = vsel %vm452_vm7, 1.0, %v2712_v22  ;;  %vm160_vm9 = vcmp.eq.s32.totalorder %v2793_v12, %v3022_v24  ;;  %v895_v47 = vsub.f32 %v2289_v42, %v2369_v46 }
  0x30   :  { %v900_v49 = vsub.f32 %v2294_v43, %v2374_v33  ;;  %v2290_v50 = vsel %vm155_vm8, 1.0, %v2712_v22  ;;  %v2295_v0 = vsel %vm160_vm9, 1.0, %v2712_v22  ;;  %vm448_vm10 = vcmp.eq.s32.totalorder %v2796_v13, %v3019_v23 }
  0x31   :  { %979 = vmatpush.bf16.msra.mxu0 %v3061_v44  ;;  %vm453_vm11 = vcmp.eq.s32.totalorder %v2796_v13, %v3022_v24  ;;  %vm156_vm12 = vcmp.eq.s32.totalorder %v2805_v16, %v3019_v23  ;;  %vm161_vm13 = vcmp.eq.s32.totalorder %v2805_v16, %v3022_v24  ;;  %v2370_v54 = vsel %vm448_vm10, 1.0, %v2712_v22 }
  0x32   :  { %v3084_v53 = vpack.c.bf16 %v900_v49, %v895_v47  ;;  %v2375_v55 = vsel %vm453_vm11, 1.0, %v2712_v22  ;;  %v2291_v58 = vsel %vm156_vm12, 1.0, %v2712_v22  ;;  %v896_v59 = vsub.f32 %v2290_v50, %v2370_v54  ;;  %v1440_v54 = vld [vmem:[%s4578_s1] sm:$0xff] }
  0x33   :  { %v901_v60 = vsub.f32 %v2295_v0, %v2375_v55  ;;  %v2296_v61 = vsel %vm161_vm13, 1.0, %v2712_v22  ;;  %vm449_vm14 = vcmp.eq.s32.totalorder %v2808_v17, %v3019_v23  ;;  %vm454_vm15 = vcmp.eq.s32.totalorder %v2808_v17, %v3022_v24  ;;  %1521 = vperm.xlu1 %2662, %v1440_v54  }
  0x34   :  { %992 = vmatpush.bf16.msra.mxu1 %v3084_v53  ;;  %v2371_v62 = vsel %vm449_vm14, 1.0, %v2712_v22  ;;  %v3097_v63 = vadd.s32 56, %v2776_v7  ;;  %vm143_vm0 = vcmp.eq.s32.totalorder %v2779_v8, %v3030_v30  ;;  %v2376_v29 = vsel %vm454_vm15, 1.0, %v2712_v22 }
  0x35   :  { %v3101_v26 = vpack.c.bf16 %v901_v60, %v896_v59  ;;  %v897_v1 = vsub.f32 %v2291_v58, %v2371_v62  ;;  %v2278_v31 = vsel %vm143_vm0, 1.0, %v2712_v22  ;;  %v902_v32 = vsub.f32 %v2296_v61, %v2376_v29 }
  0x36   :  { %vm148_vm1 = vcmp.eq.s32.totalorder %v2779_v8, %v3097_v63  ;;  %vm436_vm2 = vcmp.eq.s32.totalorder %v2782_v9, %v3030_v30  ;;  %vm441_vm3 = vcmp.eq.s32.totalorder %v2782_v9, %v3097_v63  ;;  %vm144_vm4 = vcmp.eq.s32.totalorder %v2787_v10, %v3030_v30 }
  0x37   :  { %1005 = vmatpush.bf16.msra.mxu2 %v3101_v26  ;;  %v2283_v35 = vsel %vm148_vm1, 1.0, %v2712_v22  ;;  %v2358_v37 = vsel %vm436_vm2, 1.0, %v2712_v22  ;;  %v2363_v38 = vsel %vm441_vm3, 1.0, %v2712_v22  ;;  %v3117_v39 = vpack.c.bf16 %v902_v32, %v897_v1 }
  0x38   :  { %v884_v40 = vsub.f32 %v2278_v31, %v2358_v37  ;;  %v889_v42 = vsub.f32 %v2283_v35, %v2363_v38  ;;  %vm149_vm5 = vcmp.eq.s32.totalorder %v2787_v10, %v3097_v63  ;;  %v2279_v43 = vsel %vm144_vm4, 1.0, %v2712_v22 }
  0x39   :  { %v2284_v46 = vsel %vm149_vm5, 1.0, %v2712_v22  ;;  %vm437_vm6 = vcmp.eq.s32.totalorder %v2790_v11, %v3030_v30  ;;  %vm442_vm7 = vcmp.eq.s32.totalorder %v2790_v11, %v3097_v63  ;;  %1018 = vmatpush.bf16.msra.mxu3 %v3117_v39  ;;  %vm145_vm8 = vcmp.eq.s32.totalorder %v2793_v12, %v3030_v30 }
  0x3a   :  { %v3128_v33 = vpack.c.bf16 %v889_v42, %v884_v40  ;;  %v2359_v47 = vsel %vm437_vm6, 1.0, %v2712_v22  ;;  %v2364_v49 = vsel %vm442_vm7, 1.0, %v2712_v22  ;;  %vm150_vm9 = vcmp.eq.s32.totalorder %v2793_v12, %v3097_v63 }
  0x3b   :  { %v885_v50 = vsub.f32 %v2279_v43, %v2359_v47  ;;  %v890_v0 = vsub.f32 %v2284_v46, %v2364_v49  ;;  %v2280_v51 = vsel %vm145_vm8, 1.0, %v2712_v22  ;;  %v2285_v52 = vsel %vm150_vm9, 1.0, %v2712_v22 }
  0x3c   :  { %980 = vmatpush.bf16.msra.mxu0 %v3128_v33  ;;  %vm438_vm10 = vcmp.eq.s32.totalorder %v2796_v13, %v3030_v30  ;;  %vm443_vm11 = vcmp.eq.s32.totalorder %v2796_v13, %v3097_v63  ;;  %vm146_vm12 = vcmp.eq.s32.totalorder %v2805_v16, %v3030_v30  ;;  %vm151_vm13 = vcmp.eq.s32.totalorder %v2805_v16, %v3097_v63 }
  0x3d   :  { %v3148_v55 = vpack.c.bf16 %v890_v0, %v885_v50  ;;  %v2360_v58 = vsel %vm438_vm10, 1.0, %v2712_v22  ;;  %v2365_v59 = vsel %vm443_vm11, 1.0, %v2712_v22  ;;  %v2281_v62 = vsel %vm146_vm12, 1.0, %v2712_v22 }
  0x3e   :  { %v886_v60 = vsub.f32 %v2280_v51, %v2360_v58  ;;  %v891_v61 = vsub.f32 %v2285_v52, %v2365_v59  ;;  %v2286_v29 = vsel %vm151_vm13, 1.0, %v2712_v22  ;;  %vm439_vm14 = vcmp.eq.s32.totalorder %v2808_v17, %v3030_v30 }
  0x3f   :  { %993 = vmatpush.bf16.msra.mxu1 %v3148_v55  ;;  %vm444_vm15 = vcmp.eq.s32.totalorder %v2808_v17, %v3097_v63  ;;  %v3162_v1 = vadd.s32 32, %v2776_v7  ;;  %v3165_v31 = vadd.s32 40, %v2776_v7  ;;  %v2361_v35 = vsel %vm439_vm14, 1.0, %v2712_v22 }
  0x40   :  { %v3167_v32 = vpack.c.bf16 %v891_v61, %v886_v60  ;;  %v2366_v37 = vsel %vm444_vm15, 1.0, %v2712_v22  ;;  %v3172_v38 = vadd.s32 16, %v2776_v7  ;;  %v887_v40 = vsub.f32 %v2281_v62, %v2361_v35 }
  0x41   :  { %v892_v42 = vsub.f32 %v2286_v29, %v2366_v37  ;;  %vm133_vm0 = vcmp.eq.s32.totalorder %v2779_v8, %v3162_v1  ;;  %vm138_vm1 = vcmp.eq.s32.totalorder %v2779_v8, %v3165_v31  ;;  %vm426_vm2 = vcmp.eq.s32.totalorder %v2782_v9, %v3162_v1 }
  0x42   :  { %1006 = vmatpush.bf16.msra.mxu2 %v3167_v32  ;;  %v2268_v43 = vsel %vm133_vm0, 1.0, %v2712_v22  ;;  %v2273_v46 = vsel %vm138_vm1, 1.0, %v2712_v22  ;;  %vm431_vm3 = vcmp.eq.s32.totalorder %v2782_v9, %v3165_v31  ;;  %v2348_v49 = vsel %vm426_vm2, 1.0, %v2712_v22 }
  0x43   :  { %v3185_v47 = vpack.c.bf16 %v892_v42, %v887_v40  ;;  %v2353_v50 = vsel %vm431_vm3, 1.0, %v2712_v22  ;;  %vm134_vm4 = vcmp.eq.s32.totalorder %v2787_v10, %v3162_v1  ;;  %v874_v0 = vsub.f32 %v2268_v43, %v2348_v49 }
  0x44   :  { %v879_v51 = vsub.f32 %v2273_v46, %v2353_v50  ;;  %vm139_vm5 = vcmp.eq.s32.totalorder %v2787_v10, %v3165_v31  ;;  %v2269_v52 = vsel %vm134_vm4, 1.0, %v2712_v22  ;;  %vm427_vm6 = vcmp.eq.s32.totalorder %v2790_v11, %v3162_v1 }
  0x45   :  { %1019 = vmatpush.bf16.msra.mxu3 %v3185_v47  ;;  %v2274_v54 = vsel %vm139_vm5, 1.0, %v2712_v22  ;;  %vm432_vm7 = vcmp.eq.s32.totalorder %v2790_v11, %v3165_v31  ;;  %vm135_vm8 = vcmp.eq.s32.totalorder %v2793_v12, %v3162_v1  ;;  %v2349_v59 = vsel %vm427_vm6, 1.0, %v2712_v22 }
  0x46   :  { %v3202_v58 = vpack.c.bf16 %v879_v51, %v874_v0  ;;  %v2354_v60 = vsel %vm432_vm7, 1.0, %v2712_v22  ;;  %vm140_vm9 = vcmp.eq.s32.totalorder %v2793_v12, %v3165_v31  ;;  %v875_v61 = vsub.f32 %v2269_v52, %v2349_v59  ;;  %v1449_v0 = vld [vmem:[%s4578_s1 + $0x48] sm:$0xff]  ;;  %v1443_v51 = vld [vmem:[%s4578_s1 + $0x18] sm:$0xff]  ;;  %v1442_v52 = vld [vmem:[%s4578_s1 + $0x10] sm:$0xff] }
  0x47   :  { %v880_v62 = vsub.f32 %v2274_v54, %v2354_v60  ;;  %v2270_v29 = vsel %vm135_vm8, 1.0, %v2712_v22  ;;  %v2275_v35 = vsel %vm140_vm9, 1.0, %v2712_v22  ;;  %vm428_vm10 = vcmp.eq.s32.totalorder %v2796_v13, %v3162_v1  ;;  %1548 = vperm.xlu0 %2661, %v1449_v0   ;;  %1530 = vperm.xlu2 %2663, %v1443_v51  }
  0x48   :  { %981 = vmatpush.bf16.msra.mxu0 %v3202_v58  ;;  %vm433_vm11 = vcmp.eq.s32.totalorder %v2796_v13, %v3165_v31  ;;  %vm136_vm12 = vcmp.eq.s32.totalorder %v2805_v16, %v3162_v1  ;;  %vm141_vm13 = vcmp.eq.s32.totalorder %v2805_v16, %v3165_v31  ;;  %v2350_v40 = vsel %vm428_vm10, 1.0, %v2712_v22  ;;  %1527 = vperm.xlu1 %2662, %v1442_v52  }
  0x49   :  { %v3219_v37 = vpack.c.bf16 %v880_v62, %v875_v61  ;;  %v2355_v42 = vsel %vm433_vm11, 1.0, %v2712_v22  ;;  %v2271_v43 = vsel %vm136_vm12, 1.0, %v2712_v22  ;;  %v876_v46 = vsub.f32 %v2270_v29, %v2350_v40 }
  0x4a   :  { %v881_v49 = vsub.f32 %v2275_v35, %v2355_v42  ;;  %v2276_v50 = vsel %vm141_vm13, 1.0, %v2712_v22  ;;  %vm429_vm14 = vcmp.eq.s32.totalorder %v2808_v17, %v3162_v1  ;;  %vm434_vm15 = vcmp.eq.s32.totalorder %v2808_v17, %v3165_v31 }
  0x4b   :  { %994 = vmatpush.bf16.msra.mxu1 %v3219_v37  ;;  %v2351_v54 = vsel %vm429_vm14, 1.0, %v2712_v22  ;;  %v3241_v59 = vadd.s32 24, %v2776_v7  ;;  %vm123_vm0 = vcmp.eq.s32.totalorder %v2779_v8, %v3172_v38  ;;  %v2356_v61 = vsel %vm434_vm15, 1.0, %v2712_v22 }
  0x4c   :  { %v3245_v60 = vpack.c.bf16 %v881_v49, %v876_v46  ;;  %v877_v62 = vsub.f32 %v2271_v43, %v2351_v54  ;;  %v2258_v29 = vsel %vm123_vm0, 1.0, %v2712_v22  ;;  %v882_v35 = vsub.f32 %v2276_v50, %v2356_v61 }
  0x4d   :  { %vm128_vm1 = vcmp.eq.s32.totalorder %v2779_v8, %v3241_v59  ;;  %vm416_vm2 = vcmp.eq.s32.totalorder %v2782_v9, %v3172_v38  ;;  %vm421_vm3 = vcmp.eq.s32.totalorder %v2782_v9, %v3241_v59  ;;  %vm124_vm4 = vcmp.eq.s32.totalorder %v2787_v10, %v3172_v38 }
  0x4e   :  { %1007 = vmatpush.bf16.msra.mxu2 %v3245_v60  ;;  %v2263_v40 = vsel %vm128_vm1, 1.0, %v2712_v22  ;;  %v2338_v42 = vsel %vm416_vm2, 1.0, %v2712_v22  ;;  %v2343_v43 = vsel %vm421_vm3, 1.0, %v2712_v22  ;;  %v3261_v46 = vpack.c.bf16 %v882_v35, %v877_v62 }
  0x4f   :  { %v864_v49 = vsub.f32 %v2258_v29, %v2338_v42  ;;  %v869_v50 = vsub.f32 %v2263_v40, %v2343_v43  ;;  %vm129_vm5 = vcmp.eq.s32.totalorder %v2787_v10, %v3241_v59  ;;  %v2259_v0 = vsel %vm124_vm4, 1.0, %v2712_v22  ;;  %v1452_v40 = vld [vmem:[%s4578_s1 + $0x60] sm:$0xff]  ;;  %v1446_v42 = vld [vmem:[%s4578_s1 + $0x30] sm:$0xff]  ;;  %v1445_v43 = vld [vmem:[%s4578_s1 + $0x28] sm:$0xff] }
  0x50   :  { %4617 = vst [vmem:[#allocation5_spill] sm:$0xff] %v3261_v46  ;;  %v2264_v51 = vsel %vm129_vm5, 1.0, %v2712_v22  ;;  %vm417_vm6 = vcmp.eq.s32.totalorder %v2790_v11, %v3172_v38  ;;  %vm422_vm7 = vcmp.eq.s32.totalorder %v2790_v11, %v3241_v59  ;;  %1020 = vmatpush.bf16.msra.mxu3 %v3261_v46  ;;  %vm125_vm8 = vcmp.eq.s32.totalorder %v2793_v12, %v3172_v38 }
  0x51   :  { %v3272_v52 = vpack.c.bf16 %v869_v50, %v864_v49  ;;  %v2339_v54 = vsel %vm417_vm6, 1.0, %v2712_v22  ;;  %v2344_v61 = vsel %vm422_vm7, 1.0, %v2712_v22  ;;  %vm130_vm9 = vcmp.eq.s32.totalorder %v2793_v12, %v3241_v59  ;;  %1557 = vperm.xlu0 %2661, %v1452_v40   ;;  %1539 = vperm.xlu2 %2663, %v1446_v42  }
  0x52   :  { %v865_v62 = vsub.f32 %v2259_v0, %v2339_v54  ;;  %v870_v29 = vsub.f32 %v2264_v51, %v2344_v61  ;;  %v2260_v35 = vsel %vm125_vm8, 1.0, %v2712_v22  ;;  %v2265_v49 = vsel %vm130_vm9, 1.0, %v2712_v22  ;;  %1536 = vperm.xlu1 %2662, %v1445_v43  }
  0x53   :  { %982 = vmatpush.bf16.msra.mxu0 %v3272_v52  ;;  %vm418_vm10 = vcmp.eq.s32.totalorder %v2796_v13, %v3172_v38  ;;  %vm423_vm11 = vcmp.eq.s32.totalorder %v2796_v13, %v3241_v59  ;;  %vm126_vm12 = vcmp.eq.s32.totalorder %v2805_v16, %v3172_v38  ;;  %vm131_vm13 = vcmp.eq.s32.totalorder %v2805_v16, %v3241_v59 }
  0x54   :  { %v3298_v50 = vpack.c.bf16 %v870_v29, %v865_v62  ;;  %v2340_v0 = vsel %vm418_vm10, 1.0, %v2712_v22  ;;  %v2345_v51 = vsel %vm423_vm11, 1.0, %v2712_v22  ;;  %v2261_v2 = vsel %vm126_vm12, 1.0, %v2712_v22 }
  0x55   :  { %v866_v54 = vsub.f32 %v2260_v35, %v2340_v0  ;;  %v871_v61 = vsub.f32 %v2265_v49, %v2345_v51  ;;  %v2266_v46 = vsel %vm131_vm13, 1.0, %v2712_v22  ;;  %vm419_vm14 = vcmp.eq.s32.totalorder %v2808_v17, %v3172_v38 }
  0x56   :  { %995 = vmatpush.bf16.msra.mxu1 %v3298_v50  ;;  %vm424_vm15 = vcmp.eq.s32.totalorder %v2808_v17, %v3241_v59  ;;  %v3312_v62 = vadd.s32 8, %v2776_v7  ;;  %vm113_vm0 = vcmp.eq.s32.totalorder %v2779_v8, %v2776_v7  ;;  %v2341_v35 = vsel %vm419_vm14, 1.0, %v2712_v22 }
  0x57   :  { %v3316_v29 = vpack.c.bf16 %v871_v61, %v866_v54  ;;  %v2346_v40 = vsel %vm424_vm15, 1.0, %v2712_v22  ;;  %v2248_v42 = vsel %vm113_vm0, 1.0, %v2712_v22  ;;  %v867_v43 = vsub.f32 %v2261_v2, %v2341_v35  ;;  %v1455_v54 = vld [vmem:[%s4578_s1 + $0x78] sm:$0xff] }
  0x58   :  { %v872_v49 = vsub.f32 %v2266_v46, %v2346_v40  ;;  %vm118_vm1 = vcmp.eq.s32.totalorder %v2779_v8, %v3312_v62  ;;  %vm406_vm2 = vcmp.eq.s32.totalorder %v2782_v9, %v2776_v7  ;;  %vm411_vm3 = vcmp.eq.s32.totalorder %v2782_v9, %v3312_v62  ;;  %v1448_v9 = vld [vmem:[%s4578_s1 + $0x40] sm:$0xff]  ;;  %v1447_v61 = vld [vmem:[%s4578_s1 + $0x38] sm:$0xff] }
  0x59   :  { %1008 = vmatpush.bf16.msra.mxu2 %v3316_v29  ;;  %v2253_v0 = vsel %vm118_vm1, 1.0, %v2712_v22  ;;  %v2328_v51 = vsel %vm406_vm2, 1.0, %v2712_v22  ;;  %vm114_vm4 = vcmp.eq.s32.totalorder %v2787_v10, %v2776_v7  ;;  %v2333_v46 = vsel %vm411_vm3, 1.0, %v2712_v22  ;;  %1566 = vperm.xlu0 %2661, %v1455_v54  }
  0x5a   :  { %v3332_v2 = vpack.c.bf16 %v872_v49, %v867_v43  ;;  %v854_v8 = vsub.f32 %v2248_v42, %v2328_v51  ;;  %vm119_vm5 = vcmp.eq.s32.totalorder %v2787_v10, %v3312_v62  ;;  %v859_v35 = vsub.f32 %v2253_v0, %v2333_v46  ;;  %1545 = vperm.xlu2 %2663, %v1448_v9  }
  0x5b   :  { %v2249_v40 = vsel %vm114_vm4, 1.0, %v2712_v22  ;;  %v2254_v42 = vsel %vm119_vm5, 1.0, %v2712_v22  ;;  %vm407_vm6 = vcmp.eq.s32.totalorder %v2790_v11, %v2776_v7  ;;  %vm412_vm7 = vcmp.eq.s32.totalorder %v2790_v11, %v3312_v62  ;;  %1542 = vperm.xlu1 %2662, %v1447_v61  }
  0x5c   :  { %1021 = vmatpush.bf16.msra.mxu3 %v3332_v2  ;;  %v2329_v10 = vsel %vm407_vm6, 1.0, %v2712_v22  ;;  %vm115_vm8 = vcmp.eq.s32.totalorder %v2793_v12, %v2776_v7  ;;  %vm120_vm9 = vcmp.eq.s32.totalorder %v2793_v12, %v3312_v62  ;;  %v3358_v43 = vpack.c.bf16 %v859_v35, %v854_v8 }
  0x5d   :  { %v2334_v49 = vsel %vm412_vm7, 1.0, %v2712_v22  ;;  %v855_v0 = vsub.f32 %v2249_v40, %v2329_v10  ;;  %v2250_v51 = vsel %vm115_vm8, 1.0, %v2712_v22  ;;  %v2255_v11 = vsel %vm120_vm9, 1.0, %v2712_v22 }
  0x5e   :  { %v860_v46 = vsub.f32 %v2254_v42, %v2334_v49  ;;  %vm408_vm10 = vcmp.eq.s32.totalorder %v2796_v13, %v2776_v7  ;;  %vm413_vm11 = vcmp.eq.s32.totalorder %v2796_v13, %v3312_v62  ;;  %983 = vmatpush.bf16.msra.mxu0 %v3358_v43  ;;  %vm116_vm12 = vcmp.eq.s32.totalorder %v2805_v16, %v2776_v7 }
  0x5f   :  { %v2330_v12 = vsel %vm408_vm10, 1.0, %v2712_v22  ;;  %v2335_v8 = vsel %vm413_vm11, 1.0, %v2712_v22  ;;  %vm121_vm13 = vcmp.eq.s32.totalorder %v2805_v16, %v3312_v62  ;;  %v2251_v35 = vsel %vm116_vm12, 1.0, %v2712_v22  ;;  %v3388_v16 = vld [vmem:[%s4581_s4] sm:$0x3] }
  0x60   :  { %v3374_v54 = vpack.c.bf16 %v860_v46, %v855_v0  ;;  %v856_v9 = vsub.f32 %v2250_v51, %v2330_v12  ;;  %v861_v61 = vsub.f32 %v2255_v11, %v2335_v8  ;;  %v2256_v13 = vsel %vm121_vm13, 1.0, %v2712_v22  ;;  %v1450_v46 = vld [vmem:[%s4578_s1 + $0x50] sm:$0xff] }
  0x61   :  { %vm409_vm14 = vcmp.eq.s32.totalorder %v2808_v17, %v2776_v7  ;;  %vm414_vm15 = vcmp.eq.s32.totalorder %v2808_v17, %v3312_v62  ;;  %v3383_v40 = vperm.slane %v2766_v4, 4  ;;  %v3396_v0 = vperm.slane %v2771_v5, 4  ;;  %v1458_v4 = vld [vmem:[%s4578_s1 + $0x90] sm:$0xff]  ;;  %984 = vmatmul.bf16.vlgmr.msra.gmra.mxu0 %v3388_v16  ;;  %v1451_v5 = vld [vmem:[%s4578_s1 + $0x58] sm:$0xff] }
  0x62   :  { %996 = vmatpush.bf16.msra.mxu1 %v3374_v54  ;;  %v3391_v42 = vpack.c.bf16 %v861_v61, %v856_v9  ;;  %v2331_v10 = vsel %vm409_vm14, 1.0, %v2712_v22  ;;  %v2336_v49 = vsel %vm414_vm15, 1.0, %v2712_v22  ;;  %1575 = vperm.xlu0 %2661, %v1458_v4  }
  0x63   :  { %v857_v17 = vsub.f32 %v2251_v35, %v2331_v10  ;;  %v862_v51 = vsub.f32 %v2256_v13, %v2336_v49  ;;  %vm187_vm0 = vcmp.eq.s32.totalorder %v3383_v40, %v2799_v14  ;;  %vm192_vm1 = vcmp.eq.s32.totalorder %v3383_v40, %v2802_v15  ;;  %1554 = vperm.xlu2 %2663, %v1451_v5  }
  0x64   :  { %1009 = vmatpush.bf16.msra.mxu2 %v3391_v42  ;;  %v2322_v11 = vsel %vm187_vm0, 1.0, %v2712_v22  ;;  %v2327_v12 = vsel %vm192_vm1, 1.0, %v2712_v22  ;;  %vm480_vm2 = vcmp.eq.s32.totalorder %v3396_v0, %v2799_v14  ;;  %vm485_vm3 = vcmp.eq.s32.totalorder %v3396_v0, %v2802_v15  ;;  %1551 = vperm.xlu1 %2662, %v1450_v46  }
  0x65   :  { %v2402_v8 = vsel %vm480_vm2, 1.0, %v2712_v22  ;;  %v2407_v9 = vsel %vm485_vm3, 1.0, %v2712_v22  ;;  %vm177_vm4 = vcmp.eq.s32.totalorder %v3383_v40, %v2811_v18  ;;  %997 = vmatmul.bf16.vlgmr.msra.gmra.mxu1 %v3388_v16  ;;  %vm182_vm5 = vcmp.eq.s32.totalorder %v3383_v40, %v2814_v19 }
  0x66   :  { %1041 = vmatpush.bf16.msrb.mxu1 %v2855_v34  ;;  %v3420_v34 = vpack.c.bf16 %v862_v51, %v857_v17  ;;  %v928_v61 = vsub.f32 %v2322_v11, %v2402_v8  ;;  %v933_v35 = vsub.f32 %v2327_v12, %v2407_v9  ;;  %v2312_v14 = vsel %vm177_vm4, 1.0, %v2712_v22 }
  0x67   :  { %v2317_v15 = vsel %vm182_vm5, 1.0, %v2712_v22  ;;  %vm470_vm6 = vcmp.eq.s32.totalorder %v3396_v0, %v2811_v18  ;;  %vm475_vm7 = vcmp.eq.s32.totalorder %v3396_v0, %v2814_v19  ;;  %vm167_vm8 = vcmp.eq.s32.totalorder %v3383_v40, %v2817_v20  ;;  %1010 = vmatmul.bf16.vlgmr.msra.gmra.mxu2 %v3388_v16 }
  0x68   :  { %1054 = vmatpush.bf16.msrb.mxu2 %v2875_v41  ;;  %1022 = vmatpush.bf16.msra.mxu3 %v3420_v34  ;;  %v3440_v41 = vpack.c.bf16 %v933_v35, %v928_v61  ;;  %v2392_v13 = vsel %vm470_vm6, 1.0, %v2712_v22  ;;  %v2397_v10 = vsel %vm475_vm7, 1.0, %v2712_v22  ;;  %vm172_vm9 = vcmp.eq.s32.totalorder %v3383_v40, %v2820_v21 }
  0x69   :  { %v918_v18 = vsub.f32 %v2312_v14, %v2392_v13  ;;  %v923_v19 = vsub.f32 %v2317_v15, %v2397_v10  ;;  %v2307_v49 = vsel %vm172_vm9, 1.0, %v2712_v22  ;;  %vm460_vm10 = vcmp.eq.s32.totalorder %v3396_v0, %v2817_v20  ;;  %v1461_v20 = vld [vmem:[%s4578_s1 + $0xa8] sm:$0xff]  ;;  %v1464_v15 = vld [vmem:[%s4578_s1 + $0xc0] sm:$0xff] }
  0x6a   :  { %1042 = vmatpush.bf16.msrb.mxu1 %v2929_v3  ;;  %v2302_v3 = vsel %vm167_vm8, 1.0, %v2712_v22  ;;  %1028 = vmatpush.bf16.msrb.mxu0 %v3440_v41  ;;  %vm465_vm11 = vcmp.eq.s32.totalorder %v3396_v0, %v2820_v21  ;;  %vm157_vm12 = vcmp.eq.s32.totalorder %v3383_v40, %v3019_v23  ;;  %vm162_vm13 = vcmp.eq.s32.totalorder %v3383_v40, %v3022_v24  ;;  %v1454_v21 = vld [vmem:[%s4578_s1 + $0x70] sm:$0xff] }
  0x6b   :  { %v2387_v4 = vsel %vm465_vm11, 1.0, %v2712_v22  ;;  %v2292_v17 = vsel %vm157_vm12, 1.0, %v2712_v22  ;;  %1023 = vmatmul.bf16.vlgmr.msra.gmra.mxu3 %v3388_v16  ;;  %v2297_v46 = vsel %vm162_vm13, 1.0, %v2712_v22  ;;  %vm450_vm14 = vcmp.eq.s32.totalorder %v3396_v0, %v3019_v23  ;;  %1584 = vperm.xlu0 %2661, %v1461_v20   ;;  %v1476_v20 = vld [vmem:[%s4578_s1 + $0x120] sm:$0xff] }
  0x6c   :  { %1067 = vmatpush.bf16.msrb.mxu3 %v2892_v48  ;;  %1055 = vmatpush.bf16.msrb.mxu2 %v2941_v27  ;;  %v3460_v48 = vpack.c.bf16 %v923_v19, %v918_v18  ;;  %v2382_v27 = vsel %vm460_vm10, 1.0, %v2712_v22  ;;  %v913_v5 = vsub.f32 %v2307_v49, %v2387_v4  ;;  %vm455_vm15 = vcmp.eq.s32.totalorder %v3396_v0, %v3022_v24  ;;  %v1463_v4 = vld [vmem:[%s4578_s1 + $0xb8] sm:$0xff] }
  0x6d   :  { %v908_v51 = vsub.f32 %v2302_v3, %v2382_v27  ;;  %v2372_v11 = vsel %vm450_vm14, 1.0, %v2712_v22  ;;  %vm147_vm0 = vcmp.eq.s32.totalorder %v3383_v40, %v3030_v30  ;;  %vm152_vm1 = vcmp.eq.s32.totalorder %v3383_v40, %v3097_v63  ;;  %1563 = vperm.xlu2 %2663, %v1454_v21   ;;  %v1469_v21 = vld [vmem:[%s4578_s1 + $0xe8] sm:$0xff] }
  0x6e   :  { %1043 = vmatpush.bf16.msrb.mxu1 %v2994_v28  ;;  %v1453_v28 = vld [vmem:[%s4578_s1 + $0x68] sm:$0xff]  ;;  %1029 = vmatpush.bf16.msrb.mxu0 %v3460_v48  ;;  %v2377_v23 = vsel %vm455_vm15, 1.0, %v2712_v22  ;;  %v898_v12 = vsub.f32 %v2292_v17, %v2372_v11  ;;  %v2287_v24 = vsel %vm152_vm1, 1.0, %v2712_v22  ;;  %vm440_vm2 = vcmp.eq.s32.totalorder %v3396_v0, %v3030_v30 }
  0x6f   :  { %v903_v8 = vsub.f32 %v2297_v46, %v2377_v23  ;;  %vm445_vm3 = vcmp.eq.s32.totalorder %v3396_v0, %v3097_v63  ;;  %1560 = vperm.xlu1 %2662, %v1453_v28   ;;  %v2362_v9 = vsel %vm440_vm2, 1.0, %v2712_v22  ;;  %vm137_vm4 = vcmp.eq.s32.totalorder %v3383_v40, %v3162_v1  ;;  %v1465_v17 = vld [vmem:[%s4578_s1 + $0xc8] sm:$0xff]  ;;  %v1472_v28 = vld [vmem:[%s4578_s1 + $0x100] sm:$0xff] }
  0x70   :  { %1068 = vmatpush.bf16.msrb.mxu3 %v2958_v36  ;;  %1056 = vmatpush.bf16.msrb.mxu2 %v3005_v57  ;;  %v3489_v36 = vpack.c.bf16 %v913_v5, %v908_v51  ;;  %v2282_v57 = vsel %vm147_vm0, 1.0, %v2712_v22  ;;  %v2367_v61 = vsel %vm445_vm3, 1.0, %v2712_v22  ;;  %vm142_vm5 = vcmp.eq.s32.totalorder %v3383_v40, %v3165_v31  ;;  %v4618_v46 = vld [vmem:[#allocation5_spill] sm:$0xff] }
  0x71   :  { %v888_v30 = vsub.f32 %v2282_v57, %v2362_v9  ;;  %v893_v63 = vsub.f32 %v2287_v24, %v2367_v61  ;;  %vm430_vm6 = vcmp.eq.s32.totalorder %v3396_v0, %v3162_v1  ;;  %vm435_vm7 = vcmp.eq.s32.totalorder %v3396_v0, %v3165_v31  ;;  %v1457_v1 = vld [vmem:[%s4578_s1 + $0x88] sm:$0xff]  ;;  %v1475_v57 = vld [vmem:[%s4578_s1 + $0x118] sm:$0xff] }
  0x72   :  { %1044 = vmatpush.bf16.msrb.mxu1 %v3061_v44  ;;  %v3506_v44 = vpack.c.bf16 %v903_v8, %v898_v12  ;;  %1030 = vmatpush.bf16.msrb.mxu0 %v3489_v36  ;;  %v2277_v35 = vsel %vm142_vm5, 1.0, %v2712_v22  ;;  %v2352_v14 = vsel %vm430_vm6, 1.0, %v2712_v22  ;;  %vm127_vm8 = vcmp.eq.s32.totalorder %v3383_v40, %v3172_v38  ;;  %v1482_v12 = vld [vmem:[%s4578_s1 + $0x150] sm:$0xff] }
  0x73   :  { %vm132_vm9 = vcmp.eq.s32.totalorder %v3383_v40, %v3241_v59  ;;  %1593 = vperm.xlu0 %2661, %v1464_v15   ;;  %vm420_vm10 = vcmp.eq.s32.totalorder %v3396_v0, %v3172_v38  ;;  %vm425_vm11 = vcmp.eq.s32.totalorder %v3396_v0, %v3241_v59  ;;  %v2262_v10 = vsel %vm127_vm8, 1.0, %v2712_v22  ;;  %v1481_v15 = vld [vmem:[%s4578_s1 + $0x148] sm:$0xff] }
  0x74   :  { %1069 = vmatpush.bf16.msrb.mxu3 %v3025_v25  ;;  %1057 = vmatpush.bf16.msrb.mxu2 %v3084_v53  ;;  %v2272_v25 = vsel %vm137_vm4, 1.0, %v2712_v22  ;;  %v2357_v53 = vsel %vm435_vm7, 1.0, %v2712_v22  ;;  %v2267_v18 = vsel %vm132_vm9, 1.0, %v2712_v22  ;;  %v2347_v38 = vsel %vm425_vm11, 1.0, %v2712_v22 }
  0x75   :  { %v878_v31 = vsub.f32 %v2272_v25, %v2352_v14  ;;  %v883_v13 = vsub.f32 %v2277_v35, %v2357_v53  ;;  %1572 = vperm.xlu2 %2663, %v1457_v1   ;;  %vm117_vm12 = vcmp.eq.s32.totalorder %v3383_v40, %v2776_v7  ;;  %vm122_vm13 = vcmp.eq.s32.totalorder %v3383_v40, %v3312_v62  ;;  %v1503_v53 = vld [vmem:[%s4578_s1 + $0x1f8] sm:$0xff] }
  0x76   :  { %1045 = vmatpush.bf16.msrb.mxu1 %v3128_v33  ;;  %v1456_v33 = vld [vmem:[%s4578_s1 + $0x80] sm:$0xff]  ;;  %1031 = vmatpush.bf16.msrb.mxu0 %v3506_v44  ;;  %vm410_vm14 = vcmp.eq.s32.totalorder %v3396_v0, %v2776_v7  ;;  %vm415_vm15 = vcmp.eq.s32.totalorder %v3396_v0, %v3312_v62  ;;  %v873_v19 = vsub.f32 %v2267_v18, %v2347_v38  ;;  %v2257_v3 = vsel %vm122_vm13, 1.0, %v2712_v22  ;;  %v1467_v62 = vld [vmem:[%s4578_s1 + $0xd8] sm:$0xff]  ;;  %v3572_v0 = vpop.permute.xlu2 %1252 }
  0x77   :  { %1569 = vperm.xlu1 %2662, %v1456_v33   ;;  %v2332_v40 = vsel %vm410_vm14, 1.0, %v2712_v22  ;;  %v2337_v7 = vsel %vm415_vm15, 1.0, %v2712_v22  ;;  %v4620_v14 = vmov 0  ;;  %v1480_v33 = vld [vmem:[%s4578_s1 + $0x140] sm:$0xff] }
  0x78   :  { %1070 = vmatpush.bf16.msrb.mxu3 %v3101_v26  ;;  %1058 = vmatpush.bf16.msrb.mxu2 %v3148_v55  ;;  %v3539_v26 = vpack.c.bf16 %v893_v63, %v888_v30  ;;  %v2342_v55 = vsel %vm420_vm10, 1.0, %v2712_v22  ;;  %v863_v27 = vsub.f32 %v2257_v3, %v2337_v7  ;;  %v1478_v30 = vld [vmem:[%s4578_s1 + $0x130] sm:$0xff]  ;;  %v1477_v63 = vld [vmem:[%s4578_s1 + $0x128] sm:$0xff]  ;;  %v1483_v7 = vld [vmem:[%s4578_s1 + $0x158] sm:$0xff] }
  0x79   :  { %v868_v59 = vsub.f32 %v2262_v10, %v2342_v55  ;;  %v1518_v10 = vld [vmem:[%s4578_s1 + $0x270] sm:$0xff] }
  0x7a   :  { %1046 = vmatpush.bf16.msrb.mxu1 %v3202_v58  ;;  %1032 = vmatpush.bf16.msrb.mxu0 %v3539_v26  ;;  %v948_v58 = vpack.c.bf16 %v883_v13, %v878_v31  ;;  %v1484_v31 = vld [vmem:[%s4578_s1 + $0x160] sm:$0xff]  ;;  %v1519_v13 = vld [vmem:[%s4578_s1 + $0x278] sm:$0xff] }
  0x7b   :  { %1602 = vperm.xlu0 %2661, %v1467_v62   ;;  %v1517_v62 = vld [vmem:[%s4578_s1 + $0x268] sm:$0xff] }
  0x7c   :  { %1071 = vmatpush.bf16.msrb.mxu3 %v3167_v32  ;;  %1059 = vmatpush.bf16.msrb.mxu2 %v3219_v37  ;;  %v2252_v32 = vsel %vm117_vm12, 1.0, %v2712_v22  ;;  %v1460_v37 = vld [vmem:[%s4578_s1 + $0xa0] sm:$0xff]  ;;  %v943_v22 = vpack.c.bf16 %v873_v19, %v868_v59  ;;  %v1502_v59 = vld [vmem:[%s4578_s1 + $0x1f0] sm:$0xff]  ;;  %v1487_v19 = vld [vmem:[%s4578_s1 + $0x178] sm:$0xff] }
  0x7d   :  { %v858_v49 = vsub.f32 %v2252_v32, %v2332_v40  ;;  %1581 = vperm.xlu2 %2663, %v1460_v37   ;;  %v1516_v37 = vld [vmem:[%s4578_s1 + $0x260] sm:$0xff] }
  0x7e   :  { %1047 = vmatpush.bf16.msrb.mxu1 %v3272_v52  ;;  %v1459_v52 = vld [vmem:[%s4578_s1 + $0x98] sm:$0xff]  ;;  %1033 = vmatpush.bf16.msrb.mxu0 %v948_v58 }
  0x7f   :  { %1578 = vperm.xlu1 %2662, %v1459_v52  }
  0x80   :  { %1072 = vmatpush.bf16.msrb.mxu3 %v3245_v60  ;;  %1060 = vmatpush.bf16.msrb.mxu2 %v3298_v50  ;;  %v3579_v60 = vld [vmem:[%s4580_s3] sm:$0x3]  ;;  %v938_v50 = vpack.c.bf16 %v863_v27, %v858_v49  ;;  %v4594_v27 = vmov 1.0|1.0  }
  0x82   :  { %1048 = vmatpush.bf16.msrb.mxu1 %v3358_v43  ;;  %1034 = vmatpush.bf16.msrb.mxu0 %v943_v22  ;;  %v1470_v43 = vld [vmem:[%s4578_s1 + $0xf0] sm:$0xff] }
  0x83   :  { %1611 = vperm.xlu0 %2661, %v1470_v43   ;;  %v1500_v43 = vld [vmem:[%s4578_s1 + $0x1e0] sm:$0xff] }
  0x84   :  { %1073 = vmatpush.bf16.msrb.mxu3 %v3316_v29  ;;  %1061 = vmatpush.bf16.msrb.mxu2 %v3374_v54  ;;  %v1462_v29 = vld [vmem:[%s4578_s1 + $0xb0] sm:$0xff]  ;;  %v3597_v54 = vpop.permute.xlu2 %1256 }
  0x85   :  { %1049 = vmatmul.bf16.vlgmr.msrb.gmra.mxu1 %v3579_v60  ;;  %1590 = vperm.xlu2 %2663, %v1463_v4   ;;  %v1485_v4 = vld [vmem:[%s4578_s1 + $0x168] sm:$0xff] }
  0x86   :  { %1093 = vmatpush.bf16.msra.mxu1 %v3440_v41  ;;  %1035 = vmatpush.bf16.msrb.mxu0 %v938_v50  ;;  %v3601_v41 = vpop.permute.xlu1 %1223 }
  0x87   :  { %1062 = vmatmul.bf16.vlgmr.msrb.gmra.mxu2 %v3579_v60  ;;  %1587 = vperm.xlu1 %2662, %v1462_v29  }
  0x88   :  { %1074 = vmatpush.bf16.msrb.mxu3 %v3391_v42  ;;  %v1473_v42 = vld [vmem:[%s4578_s1 + $0x108] sm:$0xff] }
  0x89   :  { %1036 = vmatmul.bf16.vlgmr.msrb.gmra.mxu0 %v3388_v16 }
  0x8a   :  { %1094 = vmatpush.bf16.msra.mxu1 %v3460_v48  ;;  %1080 = vmatpush.bf16.msra.mxu0 %v2908_v56  ;;  %v1466_v48 = vld [vmem:[%s4578_s1 + $0xd0] sm:$0xff]  ;;  %v3612_v56 = vpop.permute.xlu0 %1260 }
  0x8b   :  { %1075 = vmatmul.bf16.vlgmr.msrb.gmra.mxu3 %v3579_v60  ;;  %1620 = vperm.xlu0 %2661, %v1473_v42  }
  0x8c   :  { %v3618_v16 = vpop.permute.xlu2 %1348 }
  0x8d   :  { %1599 = vperm.xlu2 %2663, %v1466_v48   ;;  %v1497_v48 = vld [vmem:[%s4578_s1 + $0x1c8] sm:$0xff] }
  0x8e   :  { %1095 = vmatpush.bf16.msra.mxu1 %v3489_v36  ;;  %1081 = vmatpush.bf16.msra.mxu0 %v2976_v45  ;;  %v3622_v45 = vpop.permute.xlu1 %1228 }
  0x8f   :  { %1596 = vperm.xlu1 %2662, %v1465_v17  }
  0x92   :  { %1096 = vmatpush.bf16.msra.mxu1 %v3506_v44  ;;  %1082 = vmatpush.bf16.msra.mxu0 %v3044_v6  ;;  %v1468_v6 = vld [vmem:[%s4578_s1 + $0xe0] sm:$0xff]  ;;  %v3634_v51 = vpop.permute.xlu0 %1360  ;;  %v1486_v44 = vld [vmem:[%s4578_s1 + $0x170] sm:$0xff] }
  0x93   :  { %1629 = vperm.xlu0 %2661, %v1476_v20   ;;  %v1515_v20 = vld [vmem:[%s4578_s1 + $0x258] sm:$0xff] }
  0x94   :  { %v3636_v5 = vpop.permute.xlu2 %1356 }
  0x95   :  { %1608 = vperm.xlu2 %2663, %v1469_v21   ;;  %v1514_v21 = vld [vmem:[%s4578_s1 + $0x250] sm:$0xff] }
  0x96   :  { %1097 = vmatpush.bf16.msra.mxu1 %v3539_v26  ;;  %1083 = vmatpush.bf16.msra.mxu0 %v3117_v39  ;;  %v1479_v39 = vld [vmem:[%s4578_s1 + $0x138] sm:$0xff]  ;;  %v3646_v11 = vpop.permute.xlu1 %1264 }
  0x97   :  { %1605 = vperm.xlu1 %2662, %v1468_v6  }
  0x9a   :  { %1098 = vmatpush.bf16.msra.mxu1 %v948_v58  ;;  %1084 = vmatpush.bf16.msra.mxu0 %v3185_v47  ;;  %v1471_v47 = vld [vmem:[%s4578_s1 + $0xf8] sm:$0xff]  ;;  %v3652_v23 = vpop.permute.xlu0 %1213  ;;  %v1501_v58 = vld [vmem:[%s4578_s1 + $0x1e8] sm:$0xff] }
  0x9b   :  { %1638 = vperm.xlu0 %2661, %v1479_v39  }
  0x9c   :  { %v1525_v36 = vpop.permute.xlu2 %1524 }
  0x9d   :  { %1617 = vperm.xlu2 %2663, %v1472_v28  }
  0x9e   :  { %1099 = vmatpush.bf16.msra.mxu1 %v943_v22  ;;  %1085 = vmatpush.bf16.msra.mxu0 %v4618_v46  ;;  %v3665_v8 = vpop.permute.xlu1 %1352 }
  0x9f   :  { %1614 = vperm.xlu1 %2662, %v1471_v47  }
  0xa2   :  { %1100 = vmatpush.bf16.msra.mxu1 %v938_v50  ;;  %1086 = vmatpush.bf16.msra.mxu0 %v3332_v2  ;;  %v1474_v2 = vld [vmem:[%s4578_s1 + $0x110] sm:$0xff]  ;;  %v3670_v9 = vpop.permute.xlu0 %1218  ;;  %v1512_v50 = vld [vmem:[%s4578_s1 + $0x240] sm:$0xff] }
  0xa3   :  { %1647 = vperm.xlu0 %2661, %v1482_v12  }
  0xa4   :  { %v3668_v24 = vpop.permute.xlu2 %1530 }
  0xa5   :  { %1101 = vmatmul.bf16.vlgmr.msra.gmra.mxu1 %v3579_v60  ;;  %1626 = vperm.xlu2 %2663, %v1475_v57   ;;  %v1499_v57 = vld [vmem:[%s4578_s1 + $0x1d8] sm:$0xff] }
  0xa6   :  { %1087 = vmatpush.bf16.msra.mxu0 %v3420_v34  ;;  %v4619_v34 = vlaneseq  ;;  %v1522_v35 = vpop.permute.xlu1 %1521 }
  0xa7   :  { %1623 = vperm.xlu1 %2662, %v1474_v2  }
  0xa8   :  { %v3673_v61 = vand.u32 127, %v4619_v34  ;;  %v1498_v34 = vld [vmem:[%s4578_s1 + $0x1d0] sm:$0xff] }
  0xa9   :  { %1088 = vmatmul.bf16.vlgmr.msra.gmra.mxu0 %v3579_v60 }
  0xaa   :  { %vm1761_vm0 = vcmp.eq.s32.totalorder %v1525_v36, %v3673_v61  ;;  %vm1760_vm1 = vcmp.eq.s32.totalorder %v1522_v35, %v3673_v61  ;;  %v3698_v1 = vpop.permute.xlu0 %1533  ;;  %v1494_v36 = vld [vmem:[%s4578_s1 + $0x1b0] sm:$0xff] }
  0xab   :  { %1659 = vperm.xlu0 %2661, %v1486_v44   ;;  %vm3688_vm2 = vmpackc.low %vm1761_vm0, %vm1760_vm1 }
  0xac   :  { %v3685_v25 = vpop.permute.xlu2 %1539  ;;  %v4621_v14 = vsel %vm3688_vm2, 4294967295, %v4620_v14 }
  0xad   :  { %1635 = vperm.xlu2 %2663, %v1478_v30  }
  0xaf   :  { %1632 = vperm.xlu1 %2662, %v1477_v63  }
  0xb3   :  { %1710 = vperm.xlu0 %2661, %v1503_v53  }
  0xb4   :  { %v3703_v26 = vpop.permute.xlu2 %1545 }
  0xb5   :  { %1644 = vperm.xlu2 %2663, %v1481_v15   ;;  %vm1768_vm0 = vcmp.eq.s32.totalorder %v3703_v26, %v3673_v61 }
  0xb7   :  { %1641 = vperm.xlu1 %2662, %v1480_v33   ;;  %v4632_v33 = vmov 0 }
  0xb9   :  { %v3714_v18 = vpop.permute.xlu0 %1548 }
  0xba   :  { %v3716_v55 = vpop.permute.xlu1 %1527  ;;  %vm1769_vm14 = vcmp.eq.s32.totalorder %v3714_v18, %v3673_v61 }
  0xbb   :  { %1653 = vperm.xlu0 %2661, %v1484_v31   ;;  %vm3810_vm1 = vmpackc.low %vm1769_vm14, %vm1768_vm0  ;;  %vm1762_vm0 = vcmp.eq.s32.totalorder %v3716_v55, %v3673_v61 }
  0xbd   :  { %1758 = vperm.xlu2 %2663, %v1519_v13   ;;  %v1555_v38 = vpop.permute.xlu2 %1554  ;;  %v4634_v13 = vmov 0 }
  0xbe   :  { %vm1771_vm13 = vcmp.eq.s32.totalorder %v1555_v38, %v3673_v61  ;;  %v1496_v38 = vld [vmem:[%s4578_s1 + $0x1c0] sm:$0xff] }
  0xbf   :  { %1755 = vperm.xlu1 %2662, %v1518_v10  }
  0xc3   :  { %1704 = vperm.xlu0 %2661, %v1501_v58   ;;  %v1558_v32 = vpop.permute.xlu0 %1557  ;;  %v4636_v58 = vmov 0 }
  0xc4   :  { %v3727_v3 = vpop.permute.xlu1 %1536  ;;  %vm1772_vm9 = vcmp.eq.s32.totalorder %v1558_v32, %v3673_v61  ;;  %v4638_v32 = vmov 0 }
  0xc5   :  { %1707 = vperm.xlu2 %2663, %v1502_v59   ;;  %v1513_v59 = vld [vmem:[%s4578_s1 + $0x248] sm:$0xff] }
  0xc7   :  { %1662 = vperm.xlu1 %2662, %v1487_v19   ;;  %v1564_v40 = vpop.permute.xlu2 %1563 }
  0xc8   :  { %vm1774_vm3 = vcmp.eq.s32.totalorder %v1564_v40, %v3673_v61  ;;  %v1506_v40 = vld [vmem:[%s4578_s1 + $0x210] sm:$0xff] }
  0xcb   :  { %1650 = vperm.xlu0 %2661, %v1483_v7   ;;  %v1567_v52 = vpop.permute.xlu0 %1566  ;;  %v1510_v7 = vld [vmem:[%s4578_s1 + $0x230] sm:$0xff] }
  0xcc   :  { %vm1775_vm4 = vcmp.eq.s32.totalorder %v1567_v52, %v3673_v61 }
  0xcd   :  { %1752 = vperm.xlu2 %2663, %v1517_v62   ;;  %vm3740_vm5 = vmpackc.low %vm1775_vm4, %vm1774_vm3  ;;  %v1543_v49 = vpop.permute.xlu1 %1542 }
  0xce   :  { %2489 = vmatpush.bf16.msk.msra.mxu2 %vm3740_vm5, %v4594_v27 }
  0xcf   :  { %1749 = vperm.xlu1 %2662, %v1516_v37   ;;  %v1573_v60 = vpop.permute.xlu2 %1572 }
  0xd0   :  { %vm1777_vm3 = vcmp.eq.s32.totalorder %v1573_v60, %v3673_v61 }
  0xd3   :  { %1737 = vperm.xlu0 %2661, %v1512_v50   ;;  %v1491_v50 = vld [vmem:[%s4578_s1 + $0x198] sm:$0xff] }
  0xd4   :  { %v3756_v29 = vpop.permute.xlu0 %1575 }
  0xd5   :  { %1701 = vperm.xlu2 %2663, %v1500_v43   ;;  %v1508_v43 = vld [vmem:[%s4578_s1 + $0x220] sm:$0xff] }
  0xd6   :  { %v1552_v42 = vpop.permute.xlu1 %1551 }
  0xd7   :  { %1656 = vperm.xlu1 %2662, %v1485_v4   ;;  %v1582_v17 = vpop.permute.xlu2 %1581  ;;  %vm1770_vm12 = vcmp.eq.s32.totalorder %v1552_v42, %v3673_v61 }
  0xd8   :  { %vm1780_vm6 = vcmp.eq.s32.totalorder %v1582_v17, %v3673_v61  ;;  %vm3801_vm15 = vmpackc.low %vm1771_vm13, %vm1770_vm12  ;;  %vm1765_vm12 = vcmp.eq.s32.totalorder %v3727_v3, %v3673_v61  ;;  %vm1764_vm13 = vcmp.eq.s32.totalorder %v3698_v1, %v3673_v61 }
  0xd9   :  { %vm3851_vm14 = vmpackc.low %vm1765_vm12, %vm1764_vm13 }
  0xda   :  { %v4637_v58 = vsel %vm3851_vm14, 4294967295, %v4636_v58 }
  0xdb   :  { %1692 = vperm.xlu0 %2661, %v1497_v48   ;;  %v1495_v48 = vld [vmem:[%s4578_s1 + $0x1b8] sm:$0xff] }
  0xdd   :  { %1746 = vperm.xlu2 %2663, %v1515_v20   ;;  %v1585_v6 = vpop.permute.xlu0 %1584 }
  0xde   :  { %vm1781_vm7 = vcmp.eq.s32.totalorder %v1585_v6, %v3673_v61  ;;  %v3769_v39 = vpop.f32.mrf.mxu0 }
  0xdf   :  { %1743 = vperm.xlu1 %2662, %v1514_v21   ;;  %vm3771_vm8 = vmpackc.low %vm1781_vm7, %vm1780_vm6  ;;  %v3793_v2 = vpop.permute.xlu2 %1590  ;;  %vm1767_vm7 = vcmp.eq.s32.totalorder %v1543_v49, %v3673_v61 }
  0xe1   :  { %v1561_v28 = vpop.permute.xlu1 %1560 }
  0xe2   :  { %v3776_v47 = vpop.f32.mrf.mxu1  ;;  %vm1773_vm10 = vcmp.eq.s32.totalorder %v1561_v28, %v3673_v61 }
  0xe3   :  { %vm3782_vm11 = vmpackc.low %vm1773_vm10, %vm1772_vm9  ;;  %1683 = vperm.xlu0 %2661, %v1494_v36   ;;  %vm1766_vm9 = vcmp.eq.s32.totalorder %v3685_v25, %v3673_v61  ;;  %v1509_v25 = vld [vmem:[%s4578_s1 + $0x228] sm:$0xff] }
  0xe4   :  { %2491 = vmatpush.bf16.msk.msra.mxu2 %vm3782_vm11, %v4594_v27  ;;  %vm3832_vm10 = vmpackc.low %vm1767_vm7, %vm1766_vm9  ;;  %vm4586_vm7 = vcmask 1042432  }
  0xe5   :  { %1698 = vperm.xlu2 %2663, %v1499_v57   ;;  %v3823_v31 = vpop.permute.xlu0 %1593  ;;  %v4635_v13 = vsel %vm3832_vm10, 4294967295, %v4634_v13  ;;  %v4640_v57 = vmov 0 }
  0xe6   :  { %v987_v30 = vpop.f32.mrf.mxu0 }
  0xe7   :  { %1695 = vperm.xlu1 %2662, %v1498_v34   ;;  %v3836_v10 = vpop.permute.xlu2 %1599 }
  0xe8   :  { %2493 = vmatpush.bf16.msk.msra.mxu2 %vm3801_vm15, %v4594_v27 }
  0xe9   :  { %v1570_v63 = vpop.permute.xlu1 %1569 }
  0xea   :  { %v1000_v53 = vpop.f32.mrf.mxu1  ;;  %vm1776_vm4 = vcmp.eq.s32.totalorder %v1570_v63, %v3673_v61  ;;  %v3816_v15 = vpop.f32.mrf.mxu2 }
  0xeb   :  { %vm3818_vm6 = vmpackc.low %vm1777_vm3, %vm1776_vm4  ;;  %1728 = vperm.xlu0 %2661, %v1509_v25   ;;  %vm1763_vm3 = vcmp.eq.s32.totalorder %v3668_v24, %v3673_v61  ;;  %v1511_v24 = vld [vmem:[%s4578_s1 + $0x238] sm:$0xff] }
  0xec   :  { %v4633_v33 = vsel %vm3818_vm6, 4294967295, %v4632_v33  ;;  %2495 = vmatpush.bf16.msk.msra.mxu2 %vm3810_vm1, %v4594_v27  ;;  %vm3867_vm4 = vmpackc.low %vm1763_vm3, %vm1762_vm0 }
  0xed   :  { %1689 = vperm.xlu2 %2663, %v1496_v38   ;;  %v3863_v19 = vpop.permute.xlu0 %1602  ;;  %v4639_v32 = vsel %vm3867_vm4, 4294967295, %v4638_v32 }
  0xee   :  { %v3830_v26 = vpop.f32.mrf.mxu3 }
  0xef   :  { %1740 = vperm.xlu1 %2662, %v1513_v59   ;;  %v3871_v3 = vpop.permute.xlu2 %1608 }
  0xf0   :  { %2497 = vmatpush.bf16.msk.msra.mxu2 %vm3832_vm10, %v4594_v27 }
  0xf1   :  { %v3876_v55 = vpop.permute.xlu1 %1578 }
  0xf2   :  { %v1013_v18 = vpop.f32.mrf.mxu2 }
  0xf3   :  { %1719 = vperm.xlu0 %2661, %v1506_v40  }
  0xf4   :  { %2499 = vmatpush.bf16.msk.msra.mxu2 %vm3851_vm14, %v4594_v27 }
  0xf5   :  { %1734 = vperm.xlu2 %2663, %v1511_v24   ;;  %v3890_v62 = vpop.permute.xlu0 %1611 }
  0xf6   :  { %v1026_v1 = vpop.f32.mrf.mxu3  ;;  %vm4650_vm0 = vcmp.eq.s32.totalorder %v3890_v62, %v3673_v61 }
  0xf7   :  { %1731 = vperm.xlu1 %2662, %v1510_v7   ;;  %v1618_v60 = vpop.permute.xlu2 %1617 }
  0xf8   :  { %2501 = vmatpush.bf16.msk.msra.mxu2 %vm3867_vm4, %v4594_v27  ;;  %vm1792_vm9 = vcmp.eq.s32.totalorder %v1618_v60, %v3673_v61  ;;  %vm4649_vm4 = vcmask 1042432  }
  0xf9   :  { %v3904_v42 = vpop.permute.xlu1 %1587 }
  0xfb   :  { %1674 = vperm.xlu0 %2661, %v1491_v50  }
  0xfc   :  { %2503 = vmatpush.bf16.msk.msra.mxu2 %vm3688_vm2, %v4594_v27 }
  0xfd   :  { %1725 = vperm.xlu2 %2663, %v1508_v43   ;;  %v1621_v21 = vpop.permute.xlu0 %1620 }
  0xfe   :  { %vm1793_vm12 = vcmp.eq.s32.totalorder %v1621_v21, %v3673_v61  ;;  %v1488_v21 = vld [vmem:[%s4578_s1 + $0x180] sm:$0xff] }
  0xff   :  { %1686 = vperm.xlu1 %2662, %v1495_v48   ;;  %vm3914_vm13 = vmpackc.low %vm1793_vm12, %vm1792_vm9  ;;  %v3926_v1 = vpop.permute.xlu2 %1626 }
 0x100   :  { %v4641_v57 = vsel %vm3914_vm13, 4294967295, %v4640_v57 }
 0x101   :  { %4642 = vst [vmem:[#allocation5_spill] sm:$0xff] %v4641_v57  ;;  %v3928_v24 = vpop.permute.xlu1 %1596 }
 0x102   :  { %v1050_v37 = vpop.f32.mrf.mxu1 }
 0x103   :  { %v3893_v52 = vadd.f32 %v1050_v37, %v3769_v39  ;;  %1665 = vperm.xlu0 %2661, %v1488_v21  }
 0x105   :  { %v1106_v49 = vmul.f32 %v3893_v52, %v3893_v52 }
 0x106   :  { %v1037_v20 = vpop.f32.mrf.mxu0 }
 0x107   :  { %v1112_v4 = vsel %vm4586_vm7, %v1106_v49, 0.0 }
 0x108   :  { %v1113_v17 = vrot.slane %v1112_v4, 4 }
 0x10a   :  { %v1114_v6 = vadd.f32 %v1113_v17, %v1112_v4  ;;  %v1063_v39 = vpop.f32.mrf.mxu2  ;;  %v1052_v28 = vpop.f32.mrf.mxu1 }
 0x10b   :  { %v3912_v36 = vadd.f32 %v1063_v39, %v3776_v47  ;;  %v1492_v39 = vld [vmem:[%s4578_s1 + $0x1a0] sm:$0xff] }
 0x10c   :  { %v1115_v34 = vrot.slane %v1114_v6, 2  ;;  %1677 = vperm.xlu1 %2662, %v1492_v39  }
 0x10d   :  { %v1107_v30 = vmul.f32 %v3912_v36, %v3912_v36 }
 0x10e   :  { %v1076_v63 = vpop.f32.mrf.mxu3  ;;  %v1116_v53 = vadd.f32 %v1115_v34, %v1114_v6  ;;  %v1039_v40 = vpop.f32.mrf.mxu0  ;;  %v1493_v6 = vld [vmem:[%s4578_s1 + $0x1a8] sm:$0xff] }
 0x10f   :  { %v3921_v18 = vadd.f32 %v1076_v63, %v3816_v15  ;;  %v1119_v25 = vsel %vm4586_vm7, %v1107_v30, 0.0  ;;  %1680 = vperm.xlu2 %2663, %v1493_v6   ;;  %v3943_v63 = vpop.permute.xlu0 %1629 }
 0x110   :  { %v1117_v38 = vrot.slane %v1116_v53, 1  ;;  %v1120_v59 = vrot.slane %v1119_v25, 4 }
 0x111   :  { %4643 = vst [vmem:[#allocation6_spill] sm:$0xff] %v3921_v18  ;;  %v1108_v47 = vmul.f32 %v3921_v18, %v3921_v18 }
 0x112   :  { %v3930_v7 = vadd.f32 %v1117_v38, %v1116_v53  ;;  %v1121_v37 = vadd.f32 %v1120_v59, %v1119_v25  ;;  %v1065_v60 = vpop.f32.mrf.mxu2  ;;  %v1636_v53 = vpop.permute.xlu2 %1635 }
 0x113   :  { %v1126_v49 = vsel %vm4586_vm7, %v1108_v47, 0.0  ;;  %v1606_v47 = vpop.permute.xlu1 %1605  ;;  %v1490_v60 = vld [vmem:[%s4578_s1 + $0x190] sm:$0xff]  ;;  %vm1798_vm9 = vcmp.eq.s32.totalorder %v1636_v53, %v3673_v61  ;;  %vm1789_vm7 = vcmp.eq.s32.totalorder %v3871_v3, %v3673_v61 }
 0x114   :  { %v1127_v15 = vrot.slane %v1126_v49, 4  ;;  %2664 = vrsqrt.f32 %v3930_v7  ;;  %v1122_v50 = vrot.slane %v1121_v37, 2  ;;  %vm1156_vm2 = vcmp.eq.f32.partialorder %v3930_v7, 0.0 }
 0x116   :  { %v1128_v43 = vadd.f32 %v1127_v15, %v1126_v49  ;;  %v1078_v4 = vpop.f32.mrf.mxu3  ;;  %v1123_v48 = vadd.f32 %v1122_v50, %v1121_v37  ;;  %v1507_v50 = vld [vmem:[%s4578_s1 + $0x218] sm:$0xff] }
 0x117   :  { %1671 = vperm.xlu2 %2663, %v1490_v60   ;;  %1722 = vperm.xlu1 %2662, %v1507_v50  }
 0x118   :  { %v1129_v17 = vrot.slane %v1128_v43, 2  ;;  %v1124_v28 = vrot.slane %v1123_v48, 1 }
 0x11a   :  { %v1130_v34 = vadd.f32 %v1129_v17, %v1128_v43  ;;  %v2665_v30 = vpop.eup %2664  ;;  %v3946_v38 = vadd.f32 %v1124_v28, %v1123_v48  ;;  %v1639_v48 = vpop.permute.xlu0 %1638  ;;  %v1157_v28 = vand.u32 2147483648, %v3930_v7 }
 0x11b   :  { %v1148_v25 = vmul.f32 %v2665_v30, %v3930_v7  ;;  %v3964_v17 = vpop.permute.xlu2 %1644  ;;  %vm1799_vm12 = vcmp.eq.s32.totalorder %v1639_v48, %v3673_v61  ;;  %v1505_v48 = vld [vmem:[%s4578_s1 + $0x208] sm:$0xff] }
 0x11c   :  { %v1131_v59 = vrot.slane %v1130_v34, 1  ;;  %2666 = vrsqrt.f32 %v3946_v38  ;;  %4645 = vst [vmem:[#allocation8_spill] sm:$0xff] %v3964_v17  ;;  %vm3975_vm3 = vmpackc.low %vm1799_vm12, %vm1798_vm9  ;;  %vm1788_vm12 = vcmp.eq.s32.totalorder %v1606_v47, %v3673_v61 }
 0x11d   :  { %v1149_v40 = vmul.f32 %v2665_v30, %v1148_v25  ;;  %v4646_v25 = vmov 0 }
 0x11e   :  { %v3949_v37 = vadd.f32 %v1131_v59, %v1130_v34  ;;  %v4647_v25 = vsel %vm3975_vm3, 4294967295, %v4646_v25  ;;  %v4651_v59 = vmov 0  ;;  %vm4660_vm3 = vcmp.eq.s32.totalorder %v3836_v10, %v3673_v61 }
 0x11f   :  { %v1150_v49 = vmul.f32 0.5, %v1149_v40  ;;  %4648 = vst [vmem:[#allocation9_spill] sm:$0xff] %v4647_v25  ;;  %1716 = vperm.xlu2 %2663, %v1505_v48  }
 0x120   :  { %2668 = vrsqrt.f32 %v3949_v37  ;;  %v1181_v10 = vand.u32 2147483648, %v3949_v37 }
 0x121   :  { %v1151_v43 = vsub.f32 1.5, %v1150_v49 }
 0x122   :  { %v1102_v15 = vpop.f32.mrf.mxu1  ;;  %v2667_v21 = vpop.eup %2666 }
 0x123   :  { %v3958_v4 = vadd.f32 %v1102_v15, %v1037_v20  ;;  %v1152_v6 = vmul.f32 %v2665_v30, %v1151_v43  ;;  %v1615_v20 = vpop.permute.xlu1 %1614  ;;  %v1160_v34 = vmul.f32 %v2667_v21, %v3946_v38  ;;  %v4039_v47 = vpop.permute.xlu0 %1647 }
 0x124   :  { %vm1791_vm13 = vcmp.eq.s32.totalorder %v1615_v20, %v3673_v61 }
 0x125   :  { %4644 = vst [vmem:[#allocation7_spill] sm:$0xff] %v3958_v4  ;;  %v1110_v39 = vmul.f32 %v3958_v4, %v3958_v4  ;;  %v1153_v30 = vmul.f32 %v1152_v6, %v3930_v7  ;;  %vm3988_vm14 = vmpackc.low %vm1791_vm13, %vm4650_vm0  ;;  %v1161_v49 = vmul.f32 %v2667_v21, %v1160_v34 }
 0x126   :  { %v4652_v59 = vsel %vm3988_vm14, 4294967295, %v4651_v59  ;;  %v3992_v40 = vpop.eup %2668  ;;  %v1089_v60 = vpop.f32.mrf.mxu0  ;;  %2505 = vmatpush.bf16.msk.msra.mxu3 %vm3988_vm14, %v4594_v27  ;;  %vm1180_vm14 = vcmp.eq.f32.partialorder %v3949_v37, 0.0 }
 0x127   :  { %v1140_v53 = vsel %vm4649_vm4, %v1110_v39, 0.0  ;;  %4653 = vst [vmem:[#allocation10_spill] sm:$0xff] %v4652_v59  ;;  %vm4654_vm4 = vcmp.eq.f32.partialorder %v3930_v7, inf  ;;  %v1172_v50 = vmul.f32 %v3992_v40, %v3949_v37  ;;  %v4007_v43 = vadd.f32 %v1089_v60, %v3830_v26  ;;  %v1504_v26 = vld [vmem:[%s4578_s1 + $0x200] sm:$0xff] }
 0x128   :  { %v1141_v15 = vrot.slane %v1140_v53, 4  ;;  %v1155_v62 = vsel %vm4654_vm4, %v3930_v7, %v1153_v30  ;;  %v1162_v39 = vmul.f32 0.5, %v1161_v49  ;;  %1713 = vperm.xlu1 %2662, %v1504_v26   ;;  %vm4659_vm4 = vcmask 1042432  }
 0x129   :  { %4655 = vst [vmem:[#allocation11_spill] sm:$0xff] %v4007_v43  ;;  %v1158_v6 = vsel %vm1156_vm2, %v1157_v28, %v1155_v62  ;;  %vm4029_vm2 = vmpackc.low %vm1789_vm7, %vm1788_vm12  ;;  %v1173_v62 = vmul.f32 %v3992_v40, %v1172_v50  ;;  %v1109_v48 = vmul.f32 %v4007_v43, %v4007_v43  ;;  %vm1783_vm12 = vcmp.eq.s32.totalorder %v3793_v2, %v3673_v61 }
 0x12a   :  { %v1142_v20 = vadd.f32 %v1141_v15, %v1140_v53  ;;  %v1104_v34 = vpop.f32.mrf.mxu1  ;;  %v1231_v30 = vmul.f32 %v3652_v23, %v1158_v6  ;;  %v1236_v60 = vmul.f32 %v3670_v9, %v1158_v6  ;;  %v1241_v7 = vmul.f32 %v3601_v41, %v1158_v6  ;;  %2507 = vmatpush.bf16.msk.msra.mxu3 %vm4029_vm2, %v4594_v27 }
 0x12b   :  { %v1246_v28 = vmul.f32 %v3622_v45, %v1158_v6  ;;  %v4656_v53 = vmov 0  ;;  %v1163_v49 = vsub.f32 1.5, %v1162_v39  ;;  %v1169_v15 = vand.u32 2147483648, %v3946_v38  ;;  %v4041_v6 = vpop.permute.xlu2 %1758  ;;  %v4051_v34 = vpop.permute.xlu1 %1623 }
 0x12c   :  { %v4657_v53 = vsel %vm4029_vm2, 4294967295, %v4656_v53  ;;  %v1267_v3 = vadd.f32 %v3572_v0, %v1231_v30  ;;  %v1272_v39 = vadd.f32 %v3597_v54, %v1236_v60  ;;  %v1277_v50 = vadd.f32 %v3612_v56, %v1241_v7 }
 0x12d   :  { %4658 = vst [vmem:[#allocation12_spill] sm:$0xff] %v4657_v53  ;;  %v1282_v26 = vadd.f32 %v3646_v11, %v1246_v28  ;;  %v1164_v4 = vmul.f32 %v2667_v21, %v1163_v49  ;;  %v1174_v59 = vmul.f32 0.5, %v1173_v62  ;;  %v1133_v53 = vsel %vm4659_vm4, %v1109_v48, 0.0 }
 0x12e   :  { %v1143_v27 = vrot.slane %v1142_v20, 2  ;;  %vm1287_vm9 = vcmp.gt.f32.partialorder %v1267_v3, 0.0  ;;  %vm1292_vm0 = vcmp.gt.f32.partialorder %v1272_v39, 0.0  ;;  %vm1297_vm13 = vcmp.gt.f32.partialorder %v1277_v50, 0.0  ;;  %v1091_v62 = vpop.f32.mrf.mxu0 }
 0x12f   :  { %vm1302_vm2 = vcmp.gt.f32.partialorder %v1282_v26, 0.0  ;;  %vm4661_vm7 = vcmp.eq.s32.totalorder %v3863_v19, %v3673_v61  ;;  %v4662_v30 = vmov 0  ;;  %v1307_v21 = vmul.f32 0.2, %v1267_v3 }
 0x130   :  { %vm4063_vm10 = vmpackc.low %vm4661_vm7, %vm4660_vm3  ;;  %v1312_v60 = vmul.f32 0.2, %v1272_v39  ;;  %v1317_v7 = vmul.f32 0.2, %v1277_v50  ;;  %v1165_v28 = vmul.f32 %v1164_v4, %v3946_v38  ;;  %v4665_v49 = vmov 1.0|1.0  }
 0x131   :  { %v4663_v30 = vsel %vm4063_vm10, 4294967295, %v4662_v30  ;;  %2509 = vmatpush.bf16.msk.msra.mxu3 %vm4063_vm10, %v4665_v49  ;;  %v1322_v48 = vmul.f32 0.2, %v1282_v26  ;;  %v1175_v57 = vsub.f32 1.5, %v1174_v59  ;;  %v1134_v43 = vrot.slane %v1133_v53, 4 }
 0x132   :  { %4664 = vst [vmem:[#allocation13_spill] sm:$0xff] %v4663_v30  ;;  %v1327_v19 = vsel %vm1287_vm9, %v1267_v3, %v1307_v21  ;;  %v1332_v18 = vsel %vm1292_vm0, %v1272_v39, %v1312_v60  ;;  %v1337_v25 = vsel %vm1297_vm13, %v1277_v50, %v1317_v7  ;;  %vm4666_vm3 = vcmp.eq.f32.partialorder %v3946_v38, inf  ;;  %v1489_v30 = vld [vmem:[%s4578_s1 + $0x188] sm:$0xff]  ;;  %s2715_s1 = smov [#allocation2]  }
 0x133   :  { %v1167_v4 = vsel %vm4666_vm3, %v3946_v38, %v1165_v28  ;;  %v1342_v62 = vsel %vm1302_vm2, %v1282_v26, %v1322_v48  ;;  %v1363_v59 = vmul.f32 %v3618_v16, %v1327_v19  ;;  %v1368_v17 = vmul.f32 %v3665_v8, %v1332_v18  ;;  %1668 = vperm.xlu1 %2662, %v1489_v30   ;;  %v4100_v18 = vpop.permute.xlu0 %1659  ;;  %s2225_s26 = sshll.u32 %s2715_s1, 4  ;;  %s2226_s26 = int_to_ptr.vmem [resolvable:$true] %s2225_s26 }
 0x134   :  { %vm4667_vm9 = vcmp.eq.s32.totalorder %v3823_v31, %v3673_v61  ;;  %vm4668_vm13 = vcmp.eq.s32.totalorder %v3928_v24, %v3673_v61  ;;  %v1144_v39 = vadd.f32 %v1143_v27, %v1142_v20  ;;  %v1373_v50 = vmul.f32 %v3636_v5, %v1337_v25  ;;  %v4108_v20 = vpop.permute.xlu2 %1707 }
 0x135   :  { %vm4090_vm0 = vmpackc.low %vm4668_vm13, %vm4667_vm9  ;;  %vm4671_vm4 = vcmp.eq.f32.partialorder %v3946_v38, 0.0  ;;  %v1176_v21 = vmul.f32 %v3992_v40, %v1175_v57  ;;  %v1135_v31 = vadd.f32 %v1134_v43, %v1133_v53  ;;  %v1383_v24 = vadd.f32 %v1368_v17, %v1363_v59  ;;  %v4110_v57 = vpop.permute.xlu1 %1632 }
 0x136   :  { %v1170_v26 = vsel %vm4671_vm4, %v1169_v15, %v1167_v4  ;;  %2511 = vmatpush.bf16.msk.msra.mxu3 %vm4090_vm0, %v4665_v49  ;;  %v1378_v40 = vmul.f32 %v3634_v51, %v1342_v62  ;;  %vm4672_vm7 = vcmp.eq.s32.totalorder %v3904_v42, %v3673_v61  ;;  %vm4675_vm9 = vcmp.eq.f32.partialorder %v3949_v37, inf }
 0x137   :  { %v1232_v27 = vmul.f32 %v3652_v23, %v1170_v26  ;;  %v1237_v25 = vmul.f32 %v3670_v9, %v1170_v26  ;;  %v1242_v38 = vmul.f32 %v3601_v41, %v1170_v26  ;;  %v1247_v43 = vmul.f32 %v3622_v45, %v1170_v26  ;;  %vm4124_vm3 = vmpackc.low %vm1783_vm12, %vm4672_vm7 }
 0x138   :  { %v1177_v53 = vmul.f32 %v1176_v21, %v3949_v37  ;;  %v1136_v15 = vrot.slane %v1135_v31, 2  ;;  %v1384_v30 = vadd.f32 %v1383_v24, %v1373_v50  ;;  %v1145_v62 = vrot.slane %v1144_v39, 1 }
 0x139   :  { %v1268_v17 = vadd.f32 %v3572_v0, %v1232_v27  ;;  %v1273_v60 = vadd.f32 %v3597_v54, %v1237_v25  ;;  %v1278_v7 = vadd.f32 %v3612_v56, %v1242_v38  ;;  %v1283_v48 = vadd.f32 %v3646_v11, %v1247_v43 }
 0x13a   :  { %v1179_v19 = vsel %vm4675_vm9, %v3949_v37, %v1177_v53  ;;  %v1137_v4 = vadd.f32 %v1136_v15, %v1135_v31  ;;  %2513 = vmatpush.bf16.msk.msra.mxu3 %vm4124_vm3, %v4665_v49  ;;  %v1385_v42 = vadd.f32 %v1384_v30, %v1378_v40  ;;  %v4139_v43 = vadd.f32 %v1145_v62, %v1144_v39 }
 0x13b   :  { %vm1288_vm13 = vcmp.gt.f32.partialorder %v1268_v17, 0.0  ;;  %vm1293_vm4 = vcmp.gt.f32.partialorder %v1273_v60, 0.0  ;;  %vm1298_vm2 = vcmp.gt.f32.partialorder %v1278_v7, 0.0  ;;  %vm1303_vm12 = vcmp.gt.f32.partialorder %v1283_v48, 0.0  ;;  %v4141_v40 = vpop.permute.xlu0 %1710 }
 0x13c   :  { %v1308_v2 = vmul.f32 0.2, %v1268_v17  ;;  %v1313_v59 = vmul.f32 0.2, %v1273_v60  ;;  %v1182_v50 = vsel %vm1180_vm14, %v1181_v10, %v1179_v19  ;;  %v1386_v26 = vrot.slane %v1385_v42, 4 }
 0x13d   :  { %v1318_v21 = vmul.f32 0.2, %v1278_v7  ;;  %v1323_v24 = vmul.f32 0.2, %v1283_v48  ;;  %v1233_v31 = vmul.f32 %v3652_v23, %v1182_v50  ;;  %v1238_v38 = vmul.f32 %v3670_v9, %v1182_v50  ;;  %v4149_v30 = vpop.permute.xlu1 %1641 }
 0x13e   :  { %v1328_v27 = vsel %vm1288_vm13, %v1268_v17, %v1308_v2  ;;  %v1333_v25 = vsel %vm1293_vm4, %v1273_v60, %v1313_v59  ;;  %2515 = vmatpush.bf16.msk.msra.mxu3 %vm3771_vm8, %v4665_v49  ;;  %v1387_v53 = vadd.f32 %v1386_v26, %v1385_v42  ;;  %v1243_v15 = vmul.f32 %v3601_v41, %v1182_v50  ;;  %v4165_v2 = vpop.permute.xlu2 %1752 }
 0x13f   :  { %v1338_v37 = vsel %vm1298_vm2, %v1278_v7, %v1318_v21  ;;  %v1364_v10 = vmul.f32 %v3618_v16, %v1328_v27  ;;  %vm1778_vm14 = vcmp.eq.s32.totalorder %v3756_v29, %v3673_v61  ;;  %v1343_v39 = vsel %vm1303_vm12, %v1283_v48, %v1323_v24 }
 0x140   :  { %v1369_v17 = vmul.f32 %v3665_v8, %v1333_v25  ;;  %v1388_v60 = vrot.slane %v1387_v53, 2  ;;  %v1374_v19 = vmul.f32 %v3636_v5, %v1338_v37  ;;  %v1269_v62 = vadd.f32 %v3572_v0, %v1233_v31 }
 0x141   :  { %v1274_v7 = vadd.f32 %v3597_v54, %v1238_v38  ;;  %vm4676_vm2 = vcmp.eq.s32.totalorder %v3876_v55, %v3673_v61  ;;  %v4677_v42 = vmov 0  ;;  %v1248_v48 = vmul.f32 %v3622_v45, %v1182_v50 }
 0x142   :  { %vm4161_vm7 = vmpackc.low %vm4676_vm2, %vm1778_vm14  ;;  %v1392_v29 = vadd.f32 %v1369_v17, %v1364_v10  ;;  %v1138_v59 = vrot.slane %v1137_v4, 1  ;;  %2670 = vrsqrt.f32 %v4139_v43  ;;  %v1389_v26 = vadd.f32 %v1388_v60, %v1387_v53 }
 0x143   :  { %v4678_v42 = vsel %vm4161_vm7, 4294967295, %v4677_v42  ;;  %2517 = vmatpush.bf16.msk.msra.mxu3 %vm4161_vm7, %v4665_v49  ;;  %v1279_v21 = vadd.f32 %v3612_v56, %v1243_v15  ;;  %vm1289_vm9 = vcmp.gt.f32.partialorder %v1269_v62, 0.0  ;;  %vm1294_vm13 = vcmp.gt.f32.partialorder %v1274_v7, 0.0  ;;  %v4176_v17 = vpop.permute.xlu0 %1653 }
 0x144   :  { %v1379_v55 = vmul.f32 %v3634_v51, %v1343_v39  ;;  %v1393_v24 = vadd.f32 %v1392_v29, %v1374_v19  ;;  %v1309_v31 = vmul.f32 0.2, %v1269_v62  ;;  %v1314_v27 = vmul.f32 0.2, %v1274_v7 }
 0x145   :  { %v1390_v25 = vrot.slane %v1389_v26, 1  ;;  %v4174_v10 = vadd.f32 %v1138_v59, %v1137_v4  ;;  %v1284_v15 = vadd.f32 %v3646_v11, %v1248_v48  ;;  %v1319_v60 = vmul.f32 0.2, %v1279_v21  ;;  %v1756_v39 = vpop.permute.xlu1 %1755 }
 0x146   :  { %v1394_v38 = vadd.f32 %v1393_v24, %v1379_v55  ;;  %v1329_v50 = vsel %vm1289_vm9, %v1269_v62, %v1309_v31  ;;  %v1334_v37 = vsel %vm1294_vm13, %v1274_v7, %v1314_v27  ;;  %vm1299_vm4 = vcmp.gt.f32.partialorder %v1279_v21, 0.0 }
 0x147   :  { %2519 = vmatpush.bf16.msk.msra.mxu3 %vm3818_vm6, %v4665_v49  ;;  %v1391_v53 = vadd.f32 %v1390_v25, %v1389_v26  ;;  %v1365_v4 = vmul.f32 %v3618_v16, %v1329_v50  ;;  %v1370_v7 = vmul.f32 %v3665_v8, %v1334_v37  ;;  %vm1795_vm12 = vcmp.eq.s32.totalorder %v3926_v1, %v3673_v61  ;;  %v1702_v26 = vpop.permute.xlu2 %1701 }
 0x148   :  { %v2671_v19 = vpop.eup %2670  ;;  %v1395_v62 = vrot.slane %v1394_v38, 4  ;;  %2672 = vrsqrt.f32 %v4174_v10  ;;  %v1324_v59 = vmul.f32 0.2, %v1284_v15  ;;  %v1339_v22 = vsel %vm1299_vm4, %v1279_v21, %v1319_v60 }
 0x149   :  { %v1196_v48 = vmul.f32 %v2671_v19, %v4139_v43  ;;  %2674 = vtanh.f32 %v1391_v53  ;;  %v1401_v24 = vadd.f32 %v1370_v7, %v1365_v4  ;;  %vm1796_vm2 = vcmp.eq.s32.totalorder %v3943_v63, %v3673_v61 }
 0x14a   :  { %v1396_v29 = vadd.f32 %v1395_v62, %v1394_v38  ;;  %v4679_v1 = vmov 0  ;;  %vm1797_vm13 = vcmp.eq.s32.totalorder %v4110_v57, %v3673_v61  ;;  %vm1823_vm4 = vcmp.eq.s32.totalorder %v4141_v40, %v3673_v61 }
 0x14b   :  { %2569 = vmatpush.bf16.msk.msrb.mxu3 %vm3740_vm5, %v4665_v49  ;;  %v1197_v31 = vmul.f32 %v2671_v19, %v1196_v48  ;;  %vm1794_vm5 = vcmp.eq.s32.totalorder %v4051_v34, %v3673_v61  ;;  %v1375_v21 = vmul.f32 %v3636_v5, %v1339_v22  ;;  %vm4209_vm14 = vmpackc.low %vm1797_vm13, %vm1796_vm2  ;;  %v4681_v34 = vmov 0  ;;  %v1705_v63 = vpop.permute.xlu0 %1704 }
 0x14c   :  { %v1397_v55 = vrot.slane %v1396_v29, 2  ;;  %vm4198_vm9 = vmpackc.low %vm1795_vm12, %vm1794_vm5  ;;  %v4682_v34 = vsel %vm4209_vm14, 4294967295, %v4681_v34  ;;  %vm4683_vm12 = vcmp.gt.f32.partialorder %v1284_v15, 0.0  ;;  %v4684_v38 = vmov 0 }
 0x14d   :  { %v4680_v1 = vsel %vm4198_vm9, 4294967295, %v4679_v1  ;;  %v1198_v27 = vmul.f32 0.5, %v1197_v31  ;;  %v1344_v25 = vsel %vm4683_vm12, %v1284_v15, %v1324_v59  ;;  %vm1838_vm6 = vcmp.eq.s32.totalorder %v1756_v39, %v3673_v61  ;;  %v1663_v57 = vpop.permute.xlu1 %1662 }
 0x14e   :  { %v1398_v12 = vadd.f32 %v1397_v55, %v1396_v29  ;;  %v2673_v40 = vpop.eup %2672  ;;  %v1402_v50 = vadd.f32 %v1401_v24, %v1375_v21  ;;  %vm1839_vm2 = vcmp.eq.s32.totalorder %v4041_v6, %v3673_v61  ;;  %vm1820_vm13 = vcmp.eq.s32.totalorder %v1702_v26, %v3673_v61 }
 0x14f   :  { %2571 = vmatpush.bf16.msk.msrb.mxu3 %vm3782_vm11, %v4665_v49  ;;  %vm1822_vm11 = vcmp.eq.s32.totalorder %v4108_v20, %v3673_v61  ;;  %v1199_v37 = vsub.f32 1.5, %v1198_v27  ;;  %v2675_v53 = vpop.eup %2674  ;;  %v1184_v15 = vmul.f32 %v2673_v40, %v4174_v10  ;;  %v1380_v6 = vmul.f32 %v3634_v51, %v1344_v25  ;;  %v4263_v22 = vpop.permute.xlu2 %1746 }
 0x150   :  { %vm4214_vm5 = vmpackc.low %vm1823_vm4, %vm1822_vm11  ;;  %v1399_v20 = vrot.slane %v1398_v12, 1  ;;  %vm1807_vm11 = vcmp.eq.s32.totalorder %v1663_v57, %v3673_v61  ;;  %vm1806_vm12 = vcmp.eq.s32.totalorder %v4100_v18, %v3673_v61  ;;  %v4688_v62 = vmov 0 }
 0x151   :  { %v4685_v38 = vsel %vm4214_vm5, 4294967295, %v4684_v38  ;;  %2537 = vmatpush.bf16.msk.msrb.mxu1 %vm4214_vm5, %v4665_v49  ;;  %vm4229_vm4 = vmpackc.low %vm1839_vm2, %vm1838_vm6  ;;  %v1200_v39 = vmul.f32 %v2671_v19, %v1199_v37  ;;  %v1185_v4 = vmul.f32 %v2673_v40, %v1184_v15  ;;  %vm1202_vm6 = vcmp.eq.f32.partialorder %v4139_v43, inf }
 0x152   :  { %v1400_v44 = vadd.f32 %v1399_v20, %v1398_v12  ;;  %2553 = vmatpush.bf16.msk.msrb.mxu2 %vm4229_vm4, %v4665_v49  ;;  %v1205_v7 = vand.u32 2147483648, %v4139_v43  ;;  %vm4247_vm2 = vmpackc.low %vm1807_vm11, %vm1806_vm12  ;;  %v4690_v29 = vmov 0  ;;  %v1403_v18 = vadd.f32 %v1402_v50, %v1380_v6 }
 0x153   :  { %2573 = vmatpush.bf16.msk.msrb.mxu3 %vm3801_vm15, %v4665_v49  ;;  %vm1821_vm15 = vcmp.eq.s32.totalorder %v1705_v63, %v3673_v61  ;;  %v4691_v29 = vsel %vm4247_vm2, 4294967295, %v4690_v29  ;;  %v1201_v19 = vmul.f32 %v1200_v39, %v4139_v43  ;;  %2521 = vmatpush.bf16.msk.msrb.mxu0 %vm4247_vm2, %v4665_v49  ;;  %v1433_v48 = vmul.f32 %v2675_v53, %v3893_v52  ;;  %v4266_v26 = vpop.permute.xlu0 %1650 }
 0x154   :  { %vm4241_vm5 = vmpackc.low %vm1821_vm15, %vm1820_vm13  ;;  %2676 = vtanh.f32 %v1400_v44  ;;  %vm1204_vm13 = vcmp.eq.f32.partialorder %v4139_v43, 0.0  ;;  %v1186_v59 = vmul.f32 0.5, %v1185_v4  ;;  %vm1837_vm11 = vcmp.eq.s32.totalorder %v4165_v2, %v3673_v61 }
 0x155   :  { %v4689_v62 = vsel %vm4241_vm5, 4294967295, %v4688_v62  ;;  %2539 = vmatpush.bf16.msk.msrb.mxu1 %vm4241_vm5, %v4665_v49  ;;  %v1203_v35 = vsel %vm1202_vm6, %v4139_v43, %v1201_v19  ;;  %v1750_v31 = vpop.permute.xlu1 %1749  ;;  %vm4692_vm12 = vnez %v4635_v13  ;;  %v1404_v52 = vrot.slane %v1403_v18, 4 }
 0x156   :  { %v1187_v55 = vsub.f32 1.5, %v1186_v59  ;;  %v1206_v24 = vsel %vm1204_vm13, %v1205_v7, %v1203_v35  ;;  %vm4693_vm6 = vcmask 1042432   ;;  %vm1836_vm13 = vcmp.eq.s32.totalorder %v1750_v31, %v3673_v61 }
 0x157   :  { %2575 = vmatpush.bf16.msk.msrb.mxu3 %vm3810_vm1, %v4665_v49  ;;  %vm4611_vm1 = vcmask 1043456   ;;  %v1235_v12 = vmul.f32 %v3652_v23, %v1206_v24  ;;  %v1240_v21 = vmul.f32 %v3670_v9, %v1206_v24  ;;  %v1245_v43 = vmul.f32 %v3601_v41, %v1206_v24  ;;  %v4317_v31 = vpop.permute.xlu2 %1698 }
 0x158   :  { %v2040_v27 = vsel %vm4693_vm6, %v1433_v48, 1.0  ;;  %v1188_v63 = vmul.f32 %v2673_v40, %v1187_v55  ;;  %v1250_v25 = vmul.f32 %v3622_v45, %v1206_v24  ;;  %v1193_v20 = vand.u32 2147483648, %v4174_v10 }
 0x159   :  { %v1271_v13 = vadd.f32 %v3572_v0, %v1235_v12  ;;  %v1276_v50 = vadd.f32 %v3597_v54, %v1240_v21  ;;  %v1281_v37 = vadd.f32 %v3612_v56, %v1245_v43  ;;  %vm1192_vm6 = vcmp.eq.f32.partialorder %v4174_v10, 0.0 }
 0x15a   :  { %v2677_v57 = vpop.eup %2676  ;;  %v1189_v15 = vmul.f32 %v1188_v63, %v4174_v10  ;;  %vm4696_vm15 = vnez %v4637_v58  ;;  %v4301_v2 = vsel %vm4611_vm1, %v2040_v27, 0.0  ;;  %v1405_v44 = vadd.f32 %v1404_v52, %v1403_v18 }
 0x15b   :  { %2577 = vmatpush.bf16.msk.msrb.mxu3 %vm4692_vm12, %v4665_v49  ;;  %vm4287_vm12 = vmpackc.low %vm1837_vm11, %vm1836_vm13  ;;  %v1434_v40 = vmul.f32 %v2677_v57, %v3912_v36  ;;  %v1286_v6 = vadd.f32 %v3646_v11, %v1250_v25  ;;  %vm1291_vm11 = vcmp.gt.f32.partialorder %v1271_v13, 0.0  ;;  %vm4697_vm13 = vcmask 1042432   ;;  %v4309_v59 = vpop.permute.xlu0 %1737 }
 0x15c   :  { %2555 = vmatpush.bf16.msk.msrb.mxu2 %vm4287_vm12, %v4665_v49  ;;  %vm4698_vm2 = vcmp.eq.f32.partialorder %v4174_v10, inf  ;;  %vm1296_vm5 = vcmp.gt.f32.partialorder %v1276_v50, 0.0  ;;  %v1311_v4 = vmul.f32 0.2, %v1271_v13  ;;  %v1316_v58 = vmul.f32 0.2, %v1276_v50 }
 0x15d   :  { %v2041_v36 = vsel %vm4697_vm13, %v1434_v40, 1.0  ;;  %v1191_v39 = vsel %vm4698_vm2, %v4174_v10, %v1189_v15  ;;  %v1321_v48 = vmul.f32 0.2, %v1281_v37  ;;  %v1657_v10 = vpop.permute.xlu1 %1656  ;;  %vm4699_vm2 = vnez %v4639_v32 }
 0x15e   :  { %v2047_v7 = vsel %vm4611_vm1, %v2041_v36, 0.0  ;;  %v1194_v19 = vsel %vm1192_vm6, %v1193_v20, %v1191_v39  ;;  %v1406_v52 = vrot.slane %v1405_v44, 2  ;;  %v1326_v27 = vmul.f32 0.2, %v1286_v6 }
 0x15f   :  { %2579 = vmatpush.bf16.msk.msrb.mxu3 %vm4696_vm15, %v4665_v49  ;;  %v4312_v18 = vpack.c.bf16 %v2047_v7, %v4301_v2  ;;  %v1234_v35 = vmul.f32 %v3652_v23, %v1194_v19  ;;  %v1239_v55 = vmul.f32 %v3670_v9, %v1194_v19  ;;  %v1244_v24 = vmul.f32 %v3601_v41, %v1194_v19 }
 0x160   :  { %v1249_v12 = vmul.f32 %v3622_v45, %v1194_v19  ;;  %vm1301_vm15 = vcmp.gt.f32.partialorder %v1281_v37, 0.0  ;;  %v1331_v63 = vsel %vm1291_vm11, %v1271_v13, %v1311_v4  ;;  %v1336_v32 = vsel %vm1296_vm5, %v1276_v50, %v1316_v58 }
 0x161   :  { %v2055_v21 = vunpack.c.h.bf16 %v4312_v18  ;;  %v1270_v23 = vadd.f32 %v3572_v0, %v1234_v35  ;;  %v1275_v9 = vadd.f32 %v3597_v54, %v1239_v55  ;;  %v1280_v41 = vadd.f32 %v3612_v56, %v1244_v24  ;;  %v1690_v24 = vpop.permute.xlu2 %1689 }
 0x162   :  { %v1285_v43 = vadd.f32 %v3646_v11, %v1249_v12  ;;  %v1341_v45 = vsel %vm1301_vm15, %v1281_v37, %v1321_v48  ;;  %vm4700_vm1 = vnez %v4621_v14  ;;  %v1367_v20 = vmul.f32 %v3618_v16, %v1331_v63 }
 0x163   :  { %2581 = vmatpush.bf16.msk.msrb.mxu3 %vm4699_vm2, %v4665_v49  ;;  %v2060_v25 = vsub.f32 %v2047_v7, %v2055_v21  ;;  %vm1290_vm13 = vcmp.gt.f32.partialorder %v1270_v23, 0.0  ;;  %vm1295_vm2 = vcmp.gt.f32.partialorder %v1275_v9, 0.0  ;;  %vm1300_vm6 = vcmp.gt.f32.partialorder %v1280_v41, 0.0  ;;  %v1693_v4 = vpop.permute.xlu0 %1692 }
 0x164   :  { %vm1305_vm7 = vcmp.gt.f32.partialorder %v1285_v43, 0.0  ;;  %v1310_v0 = vmul.f32 0.2, %v1270_v23  ;;  %v1315_v54 = vmul.f32 0.2, %v1275_v9  ;;  %vm4701_vm5 = vcmp.gt.f32.partialorder %v1286_v6, 0.0 }
 0x165   :  { %v2065_v56 = vpack.c.bf16 %v2060_v25, %v2060_v25  ;;  %v1320_v57 = vmul.f32 0.2, %v1280_v41  ;;  %v1325_v11 = vmul.f32 0.2, %v1285_v43  ;;  %v1346_v50 = vsel %vm4701_vm5, %v1286_v6, %v1326_v27  ;;  %v1744_v7 = vpop.permute.xlu1 %1743 }
 0x166   :  { %v1330_v13 = vsel %vm1290_vm13, %v1270_v23, %v1310_v0  ;;  %v1335_v40 = vsel %vm1295_vm2, %v1275_v9, %v1315_v54  ;;  %v1372_v15 = vmul.f32 %v3665_v8, %v1336_v32  ;;  %v1407_v19 = vadd.f32 %v1406_v52, %v1405_v44 }
 0x167   :  { %2583 = vmatpush.bf16.msk.msrb.mxu3 %vm4700_vm1, %v4665_v49  ;;  %v1340_v37 = vsel %vm1300_vm6, %v1280_v41, %v1320_v57  ;;  %v1345_v36 = vsel %vm1305_vm7, %v1285_v43, %v1325_v11  ;;  %v1366_v14 = vmul.f32 %v3618_v16, %v1330_v13  ;;  %v1371_v39 = vmul.f32 %v3665_v8, %v1335_v40  ;;  %v4713_v11 = vld [vmem:[#allocation9_spill] sm:$0xff] }
 0x168   :  { %2091 = vmatmul.bf16.vlgmr.msra.gmra.mxu3 %v2065_v56  ;;  %v1376_v58 = vmul.f32 %v3636_v5, %v1340_v37  ;;  %v1377_v6 = vmul.f32 %v3636_v5, %v1341_v45  ;;  %v1419_v35 = vadd.f32 %v1372_v15, %v1367_v20  ;;  %v2054_v55 = vunpack.c.l.bf16 %v4312_v18  ;;  %v4715_v15 = vld [vmem:[#allocation6_spill] sm:$0xff] }
 0x169   :  { %v1410_v48 = vadd.f32 %v1371_v39, %v1366_v14  ;;  %v1381_v16 = vmul.f32 %v3634_v51, %v1345_v36  ;;  %v1382_v8 = vmul.f32 %v3634_v51, %v1346_v50  ;;  %vm1804_vm7 = vcmp.eq.s32.totalorder %v4176_v17, %v3673_v61  ;;  %v1735_v32 = vpop.permute.xlu2 %1734 }
 0x16a   :  { %vm1805_vm1 = vcmp.eq.s32.totalorder %v1657_v10, %v3673_v61  ;;  %v1420_v52 = vadd.f32 %v1419_v35, %v1377_v6  ;;  %v2059_v60 = vsub.f32 %v4301_v2, %v2054_v55  ;;  %vm1834_vm11 = vcmp.eq.s32.totalorder %v1744_v7, %v3673_v61  ;;  %v4717_v7 = vld [vmem:[#allocation11_spill] sm:$0xff]  ;;  %v4723_v55 = vld [vmem:[#allocation10_spill] sm:$0xff] }
 0x16b   :  { %2633 = vmatpush.bf16.msk.msra.mxu3 %vm4229_vm4, %v4665_v49  ;;  %v1411_v44 = vadd.f32 %v1410_v48, %v1376_v58  ;;  %vm4350_vm4 = vmpackc.low %vm1805_vm1, %vm1804_vm7  ;;  %vm1835_vm15 = vcmp.eq.s32.totalorder %v4263_v22, %v3673_v61  ;;  %vm1803_vm6 = vcmp.eq.s32.totalorder %v4266_v26, %v3673_v61  ;;  %v1408_v51 = vrot.slane %v1407_v19, 1  ;;  %v4382_v41 = vpop.permute.xlu0 %1683  ;;  %v4719_v48 = vld [vmem:[#allocation5_spill] sm:$0xff] }
 0x16c   :  { %2523 = vmatpush.bf16.msk.msrb.mxu0 %vm4350_vm4, %v4665_v49  ;;  %v1421_v17 = vadd.f32 %v1420_v52, %v1382_v8  ;;  %v2064_v2 = vpack.c.bf16 %v2059_v60, %v2059_v60  ;;  %vm2556_vm13 = vmpackc.low %vm1835_vm15, %vm1834_vm11  ;;  %vm1802_vm2 = vcmp.eq.s32.totalorder %v4039_v47, %v3673_v61  ;;  %v4704_v10 = vmov 0  ;;  %v4725_v60 = vld [vmem:[#allocation12_spill] sm:$0xff] }
 0x16d   :  { %v1412_v5 = vadd.f32 %v1411_v44, %v1381_v16  ;;  %2557 = vmatpush.bf16.msk.msrb.mxu2 %vm2556_vm13, %v4665_v49  ;;  %vm4368_vm5 = vmpackc.low %vm1803_vm6, %vm1802_vm2  ;;  %v1696_v21 = vpop.permute.xlu1 %1695  ;;  %vm1819_vm7 = vcmp.eq.s32.totalorder %v4317_v31, %v3673_v61  ;;  %v1409_v47 = vadd.f32 %v1408_v51, %v1407_v19  ;;  %v2138_v9 = vunpack.c.l.b16 %v4312_v18  ;;  %v4708_v31 = vld [vmem:[#allocation8_spill] sm:$0xff] }
 0x16e   :  { %v1422_v26 = vrot.slane %v1421_v17, 4  ;;  %v4705_v10 = vsel %vm4368_vm5, 4294967295, %v4704_v10  ;;  %2078 = vmatmul.bf16.vlgmr.msra.gmra.mxu2 %v2064_v2  ;;  %vm1818_vm1 = vcmp.eq.s32.totalorder %v1696_v21, %v3673_v61  ;;  %vm1801_vm15 = vcmp.eq.s32.totalorder %v4708_v31, %v3673_v61 }
 0x16f   :  { %2635 = vmatpush.bf16.msk.msra.mxu3 %vm4287_vm12, %v4665_v49  ;;  %v1413_v22 = vrot.slane %v1412_v5, 4  ;;  %vm1800_vm12 = vcmp.eq.s32.totalorder %v4149_v30, %v3673_v61  ;;  %vm4384_vm11 = vmpackc.low %vm1819_vm7, %vm1818_vm1  ;;  %vm1817_vm6 = vcmp.eq.s32.totalorder %v1693_v4, %v3673_v61  ;;  %v4709_v63 = vmov 0 }
 0x170   :  { %2525 = vmatpush.bf16.msk.msrb.mxu0 %vm4368_vm5, %v4665_v49  ;;  %v1423_v23 = vadd.f32 %v1422_v26, %v1421_v17  ;;  %2541 = vmatpush.bf16.msk.msrb.mxu1 %vm4384_vm11, %v4665_v49  ;;  %vm1816_vm2 = vcmp.eq.s32.totalorder %v1690_v24, %v3673_v61  ;;  %2678 = vtanh.f32 %v1409_v47  ;;  %v2143_v54 = vpack.c.b16 %v2138_v9, %v2138_v9 }
 0x171   :  { %v1414_v53 = vadd.f32 %v1413_v22, %v1412_v5  ;;  %vm4405_vm7 = vmpackc.low %vm1817_vm6, %vm1816_vm2  ;;  %vm4714_vm1 = vnez %v4713_v11  ;;  %vm1831_vm2 = vcmp.eq.s32.totalorder %v1735_v32, %v3673_v61  ;;  %vm4724_vm5 = vnez %v4723_v55  ;;  %v4729_v22 = vld [vmem:[#allocation7_spill] sm:$0xff] }
 0x172   :  { %v1424_v25 = vrot.slane %v1423_v23, 2 }
 0x173   :  { %2637 = vmatpush.bf16.msk.msra.mxu3 %vm2556_vm13, %v4665_v49  ;;  %v1415_v27 = vrot.slane %v1414_v53, 2  ;;  %vm4397_vm13 = vmpackc.low %vm1801_vm15, %vm1800_vm12  ;;  %vm1832_vm12 = vcmp.eq.s32.totalorder %v4309_v59, %v3673_v61  ;;  %v1729_v40 = vpop.permute.xlu0 %1728  ;;  %v1726_v59 = vpop.permute.xlu2 %1725 }
 0x174   :  { %v4710_v63 = vsel %vm4397_vm13, 4294967295, %v4709_v63  ;;  %2527 = vmatpush.bf16.msk.msrb.mxu0 %vm4397_vm13, %v4665_v49  ;;  %2543 = vmatpush.bf16.msk.msrb.mxu1 %vm4405_vm7, %v4665_v49  ;;  %v1425_v57 = vadd.f32 %v1424_v25, %v1423_v23  ;;  %vm1828_vm13 = vcmp.eq.s32.totalorder %v1726_v59, %v3673_v61 }
 0x175   :  { %v1416_v45 = vadd.f32 %v1415_v27, %v1414_v53  ;;  %v1741_v56 = vpop.permute.xlu1 %1740 }
 0x176   :  { %vm1833_vm15 = vcmp.eq.s32.totalorder %v1741_v56, %v3673_v61  ;;  %v2679_v13 = vpop.eup %2678  ;;  %v1426_v50 = vrot.slane %v1425_v57, 1 }
 0x177   :  { %v1417_v30 = vrot.slane %v1416_v45, 1  ;;  %vm2558_vm6 = vmpackc.low %vm1833_vm15, %vm1832_vm12  ;;  %v1435_v37 = vmul.f32 %v2679_v13, %v4715_v15 }
 0x178   :  { %2161 = vmatmul.bf16.vlgmr.msrb.gmra.mxu3 %v2143_v54  ;;  %2529 = vmatpush.bf16.msk.msrb.mxu0 %vm4714_vm1, %v4665_v49  ;;  %v1427_v14 = vadd.f32 %v1426_v50, %v1425_v57 }
 0x179   :  { %v1418_v20 = vadd.f32 %v1417_v30, %v1416_v45  ;;  %2559 = vmatpush.bf16.msk.msrb.mxu2 %vm2558_vm6, %v4665_v49  ;;  %2639 = vmatpush.bf16.msk.msra.mxu3 %vm2558_vm6, %v4665_v49  ;;  %vm4716_vm6 = vcmask 1042432   ;;  %v2139_v45 = vunpack.c.h.b16 %v4312_v18 }
 0x17a   :  { %v2042_v4 = vsel %vm4716_vm6, %v1435_v37, 1.0  ;;  %vm4718_vm1 = vmmov %vm4716_vm6 }
 0x17b   :  { %2680 = vtanh.f32 %v1418_v20  ;;  %v1720_v24 = vpop.permute.xlu0 %1719  ;;  %v1681_v8 = vpop.permute.xlu2 %1680  ;;  %v2144_v46 = vpack.c.b16 %v2139_v45, %v2139_v45 }
 0x17c   :  { %2531 = vmatpush.bf16.msk.msrb.mxu0 %vm4209_vm14, %v4665_v49  ;;  %vm1829_vm14 = vcmp.eq.s32.totalorder %v1729_v40, %v3673_v61  ;;  %2682 = vtanh.f32 %v1427_v14 }
 0x17d   :  { %v1732_v36 = vpop.permute.xlu1 %1731  ;;  %vm2562_vm6 = vmpackc.low %vm1829_vm14, %vm1828_vm13 }
 0x17e   :  { %vm1830_vm12 = vcmp.eq.s32.totalorder %v1732_v36, %v3673_v61 }
 0x17f   :  { %vm2560_vm15 = vmpackc.low %vm1831_vm2, %vm1830_vm12  ;;  %vm4721_vm2 = vcmask 1043456  }
 0x180   :  { %2533 = vmatpush.bf16.msk.msrb.mxu0 %vm4198_vm9, %v4665_v49  ;;  %2561 = vmatpush.bf16.msk.msrb.mxu2 %vm2560_vm15, %v4665_v49  ;;  %vm4720_vm9 = vnez %v4719_v48  ;;  %v2048_v6 = vsel %vm4721_vm2, %v2042_v4, 0.0  ;;  %vm4722_vm12 = vmmov %vm4721_vm2 }
 0x181   :  { %v2681_v39 = vpop.eup %2680  ;;  %2641 = vmatpush.bf16.msk.msra.mxu3 %vm2560_vm15, %v4665_v49  ;;  %vm1813_vm15 = vcmp.eq.s32.totalorder %v1681_v8, %v3673_v61 }
 0x182   :  { %v1436_v19 = vmul.f32 %v2681_v39, %v4717_v7  ;;  %v2683_v5 = vpop.eup %2682 }
 0x183   :  { %v1437_v26 = vmul.f32 %v2683_v5, %v4729_v22  ;;  %v1675_v47 = vpop.permute.xlu0 %1674  ;;  %v1672_v9 = vpop.permute.xlu2 %1671 }
 0x184   :  { %v2043_v58 = vsel %vm4718_vm1, %v1436_v19, 1.0  ;;  %2535 = vmatpush.bf16.msk.msrb.mxu0 %vm4720_vm9, %v4665_v49  ;;  %2563 = vmatpush.bf16.msk.msrb.mxu2 %vm2562_vm6, %v4665_v49  ;;  %vm1814_vm1 = vcmp.eq.s32.totalorder %v4382_v41, %v3673_v61 }
 0x185   :  { %v4441_v35 = vsel %vm4722_vm12, %v2043_v58, 0.0  ;;  %2643 = vmatpush.bf16.msk.msra.mxu3 %vm2562_vm6, %v4665_v49  ;;  %v1687_v44 = vpop.permute.xlu1 %1686  ;;  %vm4731_vm12 = vcmask 1042432  }
 0x186   :  { %v4447_v16 = vpack.c.bf16 %v4441_v35, %v2048_v6  ;;  %vm1815_vm14 = vcmp.eq.s32.totalorder %v1687_v44, %v3673_v61  ;;  %v2044_v23 = vsel %vm4731_vm12, %v1437_v26, 1.0 }
 0x187   :  { %vm4458_vm13 = vmpackc.low %vm1815_vm14, %vm1814_vm1  ;;  %vm4734_vm1 = vcmask 1043456   ;;  %vm1810_vm14 = vcmp.eq.s32.totalorder %v1672_v9, %v3673_v61 }
 0x188   :  { %2585 = vmatpush.bf16.msk.msra.mxu0 %vm4724_vm5, %v4665_v49  ;;  %v2056_v52 = vunpack.c.l.bf16 %v4447_v16  ;;  %vm4726_vm5 = vnez %v4725_v60  ;;  %2545 = vmatpush.bf16.msk.msrb.mxu1 %vm4458_vm13, %v4665_v49  ;;  %v2050_v31 = vsel %vm4734_vm1, %v2044_v23, 0.0 }
 0x189   :  { %v2053_v3 = vpack.c.bf16 %v2050_v31, %v2050_v31 }
 0x18a   :  { %v2061_v17 = vsub.f32 %v2048_v6, %v2056_v52 }
 0x18b   :  { %v2058_v28 = vunpack.c.l.bf16 %v2053_v3  ;;  %v1717_v25 = vpop.permute.xlu2 %1716  ;;  %v2142_v56 = vunpack.c.l.b16 %v2053_v3  ;;  %v1666_v20 = vpop.permute.xlu0 %1665 }
 0x18c   :  { %2587 = vmatpush.bf16.msk.msra.mxu0 %vm4726_vm5, %v4665_v49  ;;  %v2066_v2 = vpack.c.bf16 %v2061_v17, %v2061_v17  ;;  %vm1825_vm12 = vcmp.eq.s32.totalorder %v1717_v25, %v3673_v61 }
 0x18d   :  { %v1678_v53 = vpop.permute.xlu1 %1677  ;;  %v2063_v54 = vsub.f32 %v2050_v31, %v2058_v28  ;;  %v2147_v57 = vpack.c.b16 %v2142_v56, %v2142_v56 }
 0x18e   :  { %2104 = vmatmul.bf16.vlgmr.msrb.gmra.mxu0 %v2066_v2  ;;  %vm1812_vm2 = vcmp.eq.s32.totalorder %v1678_v53, %v3673_v61 }
 0x18f   :  { %vm4475_vm6 = vmpackc.low %vm1813_vm15, %vm1812_vm2  ;;  %v2068_v18 = vpack.c.bf16 %v2063_v54, %v2063_v54 }
 0x190   :  { %2589 = vmatpush.bf16.msk.msra.mxu0 %vm4063_vm10, %v4665_v49  ;;  %vm1811_vm10 = vcmp.eq.s32.totalorder %v1675_v47, %v3673_v61  ;;  %2547 = vmatpush.bf16.msk.msrb.mxu1 %vm4475_vm6, %v4665_v49 }
 0x191   :  { %vm4485_vm5 = vmpackc.low %vm1811_vm10, %vm1810_vm14  ;;  %vm4738_vm10 = vnez %v4633_v33  ;;  %vm4739_vm14 = vnez %v4685_v38 }
 0x194   :  { %2591 = vmatpush.bf16.msk.msra.mxu0 %vm4090_vm0, %v4665_v49  ;;  %2549 = vmatpush.bf16.msk.msrb.mxu1 %vm4485_vm5, %v4665_v49  ;;  %vm1826_vm0 = vcmp.eq.s32.totalorder %v1720_v24, %v3673_v61 }
 0x195   :  { %v1723_v32 = vpop.permute.xlu1 %1722 }
 0x196   :  { %vm1827_vm15 = vcmp.eq.s32.totalorder %v1723_v32, %v3673_v61 }
 0x197   :  { %vm2564_vm2 = vmpackc.low %vm1827_vm15, %vm1826_vm0  ;;  %vm4740_vm0 = vnez %v4689_v62  ;;  %vm1808_vm15 = vcmp.eq.s32.totalorder %v1666_v20, %v3673_v61 }
 0x198   :  { %2593 = vmatpush.bf16.msk.msra.mxu0 %vm4124_vm3, %v4665_v49  ;;  %2565 = vmatpush.bf16.msk.msrb.mxu2 %vm2564_vm2, %v4665_v49  ;;  %vm4737_vm3 = vnez %v4678_v42  ;;  %v2057_v42 = vunpack.c.h.bf16 %v4447_v16 }
 0x199   :  { %2645 = vmatpush.bf16.msk.msra.mxu3 %vm2564_vm2, %v4665_v49 }
 0x19a   :  { %v2062_v33 = vsub.f32 %v4441_v35, %v2057_v42 }
 0x19c   :  { %2595 = vmatpush.bf16.msk.msra.mxu0 %vm3771_vm8, %v4665_v49  ;;  %v2067_v38 = vpack.c.bf16 %v2062_v33, %v2062_v33 }
 0x19d   :  { %v1714_v30 = vpop.permute.xlu1 %1713 }
 0x19e   :  { %vm1824_vm8 = vcmp.eq.s32.totalorder %v1714_v30, %v3673_v61 }
 0x19f   :  { %vm2566_vm1 = vmpackc.low %vm1825_vm12, %vm1824_vm8  ;;  %vm4743_vm12 = vnez %v4691_v29  ;;  %vm4744_vm8 = vnez %v4705_v10  ;;  %v2140_v29 = vunpack.c.l.b16 %v4447_v16 }
 0x1a0   :  { %2597 = vmatpush.bf16.msk.msra.mxu0 %vm4737_vm3, %v4665_v49  ;;  %2567 = vmatpush.bf16.msk.msrb.mxu2 %vm2566_vm1, %v4665_v49 }
 0x1a1   :  { %2647 = vmatpush.bf16.msk.msra.mxu3 %vm2566_vm1, %v4665_v49  ;;  %v2145_v12 = vpack.c.b16 %v2140_v29, %v2140_v29 }
 0x1a3   :  { %2130 = vmatmul.bf16.vlgmr.msrb.gmra.mxu2 %v2068_v18 }
 0x1a4   :  { %2599 = vmatpush.bf16.msk.msra.mxu0 %vm4738_vm10, %v4665_v49  ;;  %2617 = vmatpush.bf16.msk.msra.mxu2 %vm4739_vm14, %v4665_v49 }
 0x1a5   :  { %2213 = vmatmul.bf16.vlgmr.msra.gmra.mxu3 %v2147_v57  ;;  %v1669_v13 = vpop.permute.xlu1 %1668 }
 0x1a6   :  { %vm1809_vm2 = vcmp.eq.s32.totalorder %v1669_v13, %v3673_v61  ;;  %v2141_v61 = vunpack.c.h.b16 %v4447_v16 }
 0x1a7   :  { %2174 = vmatmul.bf16.vlgmr.msra.gmra.mxu0 %v2144_v46  ;;  %vm4523_vm3 = vmpackc.low %vm1809_vm2, %vm1808_vm15 }
 0x1a8   :  { %2619 = vmatpush.bf16.msk.msra.mxu2 %vm4740_vm0, %v4665_v49  ;;  %2551 = vmatpush.bf16.msk.msrb.mxu1 %vm4523_vm3, %v4665_v49  ;;  %v2146_v62 = vpack.c.b16 %v2141_v61, %v2141_v61 }
 0x1ab   :  { %2117 = vmatmul.bf16.vlgmr.msrb.gmra.mxu1 %v2067_v38 }
 0x1ac   :  { %2601 = vmatpush.bf16.msk.msra.mxu1 %vm4743_vm12, %v4665_v49  ;;  %2621 = vmatpush.bf16.msk.msra.mxu2 %vm4384_vm11, %v4665_v49  ;;  %vm4745_vm11 = vnez %v4710_v63 }
 0x1b0   :  { %2603 = vmatpush.bf16.msk.msra.mxu1 %vm4350_vm4, %v4665_v49  ;;  %2623 = vmatpush.bf16.msk.msra.mxu2 %vm4405_vm7, %v4665_v49  ;;  %vm4746_vm4 = vnez %v4713_v11  ;;  %vm4747_vm7 = vnez %v4682_v34 }
 0x1b4   :  { %2605 = vmatpush.bf16.msk.msra.mxu1 %vm4744_vm8, %v4665_v49  ;;  %2625 = vmatpush.bf16.msk.msra.mxu2 %vm4458_vm13, %v4665_v49  ;;  %vm4748_vm13 = vnez %v4680_v1 }
 0x1b8   :  { %2607 = vmatpush.bf16.msk.msra.mxu1 %vm4745_vm11, %v4665_v49  ;;  %2627 = vmatpush.bf16.msk.msra.mxu2 %vm4475_vm6, %v4665_v49 }
 0x1bc   :  { %2609 = vmatpush.bf16.msk.msra.mxu1 %vm4746_vm4, %v4665_v49  ;;  %2629 = vmatpush.bf16.msk.msra.mxu2 %vm4485_vm5, %v4665_v49 }
 0x1c0   :  { %2611 = vmatpush.bf16.msk.msra.mxu1 %vm4747_vm7, %v4665_v49  ;;  %2631 = vmatpush.bf16.msk.msra.mxu2 %vm4523_vm3, %v4665_v49 }
 0x1c3   :  { %2200 = vmatmul.bf16.vlgmr.msra.gmra.mxu2 %v2146_v62 }
 0x1c4   :  { %2613 = vmatpush.bf16.msk.msra.mxu1 %vm4748_vm13, %v4665_v49 }
 0x1c8   :  { %2615 = vmatpush.bf16.msk.msra.mxu1 %vm4720_vm9, %v4665_v49 }
 0x1cb   :  { %2187 = vmatmul.bf16.vlgmr.msra.gmra.mxu1 %v2145_v12 }
 0x1eb   :  { %v2092_v34 = vpop.f32.mrf.mxu3 }
 0x1f1   :  { %v2079_v10 = vpop.f32.mrf.mxu2 }
 0x1f2   :  { %v2093_v63 = vadd.f32 %v2092_v34, %v2079_v10 }
 0x1f3   :  { %v2094_v43 = vpop.f32.mrf.mxu3 }
 0x1f9   :  { %v2081_v0 = vpop.f32.mrf.mxu2 }
 0x1fb   :  { %v2162_v11 = vpop.f32.mrf.mxu3 }
 0x203   :  { %v2164_v50 = vpop.f32.mrf.mxu3 }
 0x20b   :  { %v2105_v59 = vpop.f32.mrf.mxu0 }
 0x20c   :  { %v2106_v14 = vadd.f32 %v2105_v59, %v2093_v63 }
 0x213   :  { %v2107_v15 = vpop.f32.mrf.mxu0 }
 0x224   :  { %v2175_v37 = vpop.f32.mrf.mxu0 }
 0x226   :  { %v2131_v1 = vpop.f32.mrf.mxu2 }
 0x228   :  { %v2214_v36 = vpop.f32.mrf.mxu3  ;;  %v2118_v4 = vpop.f32.mrf.mxu1 }
 0x229   :  { %v2119_v7 = vadd.f32 %v2118_v4, %v2106_v14 }
 0x22b   :  { %v2132_v19 = vadd.f32 %v2131_v1, %v2119_v7 }
 0x22c   :  { %v2177_v39 = vpop.f32.mrf.mxu0 }
 0x22d   :  { %v2163_v49 = vadd.f32 %v2162_v11, %v2132_v19 }
 0x22e   :  { %v2133_v58 = vpop.f32.mrf.mxu2 }
 0x22f   :  { %v2176_v55 = vadd.f32 %v2175_v37, %v2163_v49 }
 0x230   :  { %v2216_v48 = vpop.f32.mrf.mxu3  ;;  %v2120_v6 = vpop.f32.mrf.mxu1 }
 0x246   :  { %v2201_v35 = vpop.f32.mrf.mxu2 }
 0x248   :  { %v2188_v24 = vpop.f32.mrf.mxu1 }
 0x249   :  { %v2189_v16 = vadd.f32 %v2188_v24, %v2176_v55 }
 0x24b   :  { %v2202_v8 = vadd.f32 %v2201_v35, %v2189_v16 }
 0x24d   :  { %v2215_v44 = vadd.f32 %v2214_v36, %v2202_v8 }
 0x24e   :  { %v2203_v52 = vpop.f32.mrf.mxu2 }
 0x24f   :  { %2219 = vst [vmem:[#allocation2] sm:$0xff] %v2215_v44 }
 0x250   :  { %v2190_v60 = vpop.f32.mrf.mxu1  ;;  %2230 = dma.vmem_to_hbm [thread:$0]  %s2226_s26, 128, %s2228_s0, [#allocation3]  }
 0x251   :  { %2708 = dma.done.wait [#allocation3], 128  }
 0x252   :  { %2709 = vsyncadd [#allocation3], 4294967168 }
 0x253   :  { %2235 = vsyncpa [#allocation3], 1 }

</bundles_post_ra>
